<compile_context>
chip_gen: v6e
topology: v6e:2x2x1
jax: 0.10.0
libtpu: 0.0.40
codegen_flags: <defaults>
</compile_context>

<pallas_src>
import math
import functools

import jax
import jax.numpy as jnp
from jax.experimental import pallas as pl
from jax.experimental.pallas import tpu as pltpu

# bf16 MXU operands (f32 accumulation). Set to jnp.float32 for bit-closer
# parity with the f32 PyTorch reference at ~2-4x lower MXU throughput.
MXU_DTYPE = jnp.bfloat16


def _tpu_vmem_capacity_bytes():
    try:
        return int(pltpu.get_tpu_info().vmem_capacity_bytes)
    except Exception:
        return 64 << 20            # conservative (v7x-sized) default


_VMEM_CAPACITY = _tpu_vmem_capacity_bytes()
_BIG_VMEM = _VMEM_CAPACITY >= (100 << 20)       # v5e / v6e (128 MiB per core)
VMEM_LIMIT = (80 << 20) if _BIG_VMEM else (48 << 20)
TM_CAP = 512 if _BIG_VMEM else 256              # rows (batch*seq)
TN_CAP = 1024 if _BIG_VMEM else 512             # output features
TK_CAP = 1024 if _BIG_VMEM else 512             # reduction features


def _pick_tile(dim, cap, align):
    """Largest divisor of `dim` that is <= cap and a multiple of `align`.
    Falls back to the full dim (always a legal full-extent block)."""
    if dim <= cap:
        return dim
    for t in range(cap, align - 1, -1):
        if dim % t == 0 and t % align == 0:
            return t
    # TODO(synk): pad + mask (pl.cdiv grid) for dims with no aligned divisor
    # <= cap instead of falling back to a full-extent (possibly large) block.
    return dim


# ------------------------------------------------------------------ linear --
def _linear_kernel(x_ref, w_ref, b_ref, *rest, activation, has_residual,
                   acc_in_out):
    if has_residual:
        res_ref, rest = rest[0], rest[1:]
    else:
        res_ref = None
    if acc_in_out:
        (o_ref,) = rest
        acc_ref = o_ref                    # f32 output block is the accumulator
    else:
        o_ref, acc_ref = rest
    k = pl.program_id(2)

    @pl.when(k == 0)
    def _():
        acc_ref[...] = jnp.zeros_like(acc_ref)

    acc_ref[...] += jnp.dot(
        x_ref[...].astype(MXU_DTYPE), w_ref[...].astype(MXU_DTYPE),
        preferred_element_type=jnp.float32).astype(acc_ref.dtype)

    @pl.when(k == pl.num_programs(2) - 1)
    def _():
        y = acc_ref[...].astype(jnp.float32) + b_ref[...].astype(jnp.float32)
        if activation == "relu":
            y = jnp.maximum(y, 0.0)
        if has_residual:
            y = y + res_ref[...].astype(jnp.float32)
        o_ref[...] = y.astype(o_ref.dtype)


def linear(x2d, w, b, activation=None, residual=None):
    """y = act(x @ w + b) [+ residual], tiled over (M, N, K)."""
    M, K = x2d.shape
    N = w.shape[1]
    tm = _pick_tile(M, TM_CAP, 16)
    tn = _pick_tile(N, TN_CAP, 128)
    tk = _pick_tile(K, TK_CAP, 128)
    has_res = residual is not None
    acc_in_out = (x2d.dtype == jnp.float32)

    in_specs = [
        pl.BlockSpec((tm, tk), lambda i, j, k: (i, k)),
        pl.BlockSpec((tk, tn), lambda i, j, k: (k, j)),
        pl.BlockSpec((1, tn), lambda i, j, k: (0, j)),
    ]
    args = [x2d, w, b.reshape(1, N)]
    if has_res:
        in_specs.append(pl.BlockSpec((tm, tn), lambda i, j, k: (i, j)))
        args.append(residual)
    scratch = [] if acc_in_out else [pltpu.VMEM((tm, tn), jnp.float32)]

    return pl.pallas_call(
        functools.partial(_linear_kernel, activation=activation,
                          has_residual=has_res, acc_in_out=acc_in_out),
        out_shape=jax.ShapeDtypeStruct((M, N), x2d.dtype),
        grid=(M // tm, N // tn, K // tk),
        in_specs=in_specs,
        out_specs=pl.BlockSpec((tm, tn), lambda i, j, k: (i, j)),
        scratch_shapes=scratch,
        compiler_params=pltpu.CompilerParams(
            dimension_semantics=("parallel", "parallel", "arbitrary"),
            vmem_limit_bytes=VMEM_LIMIT),
    )(*args)


# --------------------------------------------------- fused NormLayer+Linear --
def _norm_linear_kernel(x_ref, alpha_ref, beta_ref, w_ref, b_ref, o_ref,
                        xn_ref, *, eps):
    j = pl.program_id(1)

    @pl.when(j == 0)                         # normalize once per row block
    def _():
        x = x_ref[...].astype(jnp.float32)
        d = x.shape[-1]
        mean = jnp.mean(x, axis=-1, keepdims=True)
        xc = x - mean
        var = jnp.sum(xc * xc, axis=-1, keepdims=True) / (d - 1)  # torch unbiased
        inv = pl.reciprocal(jnp.sqrt(var) + eps, approx=True)     # eps on std
        xn = (alpha_ref[...].astype(jnp.float32) * xc * inv
              + beta_ref[...].astype(jnp.float32))
        xn_ref[...] = xn.astype(xn_ref.dtype)

    y = jnp.dot(xn_ref[...], w_ref[...].astype(MXU_DTYPE),
                preferred_element_type=jnp.float32)
    o_ref[...] = (y + b_ref[...].astype(jnp.float32)).astype(o_ref.dtype)


def norm_linear(x2d, norm_p, w, b, eps=1e-6):
    """y = NormLayer(x) @ w + b. d_model kept whole so row stats are exact;
    xn cached in VMEM and reused across the N tiles."""
    M, K = x2d.shape
    N = w.shape[1]
    tm = _pick_tile(M, TM_CAP, 16)
    tn = _pick_tile(N, TN_CAP, 128)
    return pl.pallas_call(
        functools.partial(_norm_linear_kernel, eps=eps),
        out_shape=jax.ShapeDtypeStruct((M, N), x2d.dtype),
        grid=(M // tm, N // tn),
        in_specs=[
            pl.BlockSpec((tm, K), lambda i, j: (i, 0)),
            pl.BlockSpec((1, K), lambda i, j: (0, 0)),
            pl.BlockSpec((1, K), lambda i, j: (0, 0)),
            pl.BlockSpec((K, tn), lambda i, j: (0, j)),
            pl.BlockSpec((1, tn), lambda i, j: (0, j)),
        ],
        out_specs=pl.BlockSpec((tm, tn), lambda i, j: (i, j)),
        scratch_shapes=[pltpu.VMEM((tm, K), MXU_DTYPE)],
        compiler_params=pltpu.CompilerParams(
            dimension_semantics=("parallel", "arbitrary"),
            vmem_limit_bytes=VMEM_LIMIT),
    )(x2d, norm_p["alpha"].reshape(1, K), norm_p["bias"].reshape(1, K),
      w, b.reshape(1, N))


# ----------------------------------------- fused Norm + FeedForward + resid --
def _ffn_kernel(x_ref, alpha_ref, beta_ref, w1_ref, b1_ref, w2_ref, b2_ref,
                res_ref, o_ref, xn_ref, *maybe_acc, eps, acc_in_out):
    acc_ref = o_ref if acc_in_out else maybe_acc[0]
    f = pl.program_id(1)

    @pl.when(f == 0)                         # normalize once per row block
    def _():
        x = x_ref[...].astype(jnp.float32)
        d = x.shape[-1]
        mean = jnp.mean(x, axis=-1, keepdims=True)
        xc = x - mean
        var = jnp.sum(xc * xc, axis=-1, keepdims=True) / (d - 1)
        inv = pl.reciprocal(jnp.sqrt(var) + eps, approx=True)
        xn = (alpha_ref[...].astype(jnp.float32) * xc * inv
              + beta_ref[...].astype(jnp.float32))
        xn_ref[...] = xn.astype(xn_ref.dtype)
        acc_ref[...] = jnp.zeros_like(acc_ref)

    h = jnp.dot(xn_ref[...], w1_ref[...].astype(MXU_DTYPE),
                preferred_element_type=jnp.float32)
    h = jnp.maximum(h + b1_ref[...].astype(jnp.float32), 0.0)
    acc_ref[...] += jnp.dot(h.astype(MXU_DTYPE), w2_ref[...].astype(MXU_DTYPE),
                            preferred_element_type=jnp.float32
                            ).astype(acc_ref.dtype)

    @pl.when(f == pl.num_programs(1) - 1)
    def _():
        y = (acc_ref[...].astype(jnp.float32) + b2_ref[...].astype(jnp.float32)
             + res_ref[...].astype(jnp.float32))
        o_ref[...] = y.astype(o_ref.dtype)


def feed_forward(p, norm_p, x, residual, eps=1e-6):
    """residual + linear2(relu(linear1(NormLayer(x)))) in one kernel; the
    (M, d_ff) hidden never touches HBM (d_ff tiled as the reduction axis)."""
    bs, s, d = x.shape
    M = bs * s
    d_ff = p["l1"]["w"].shape[1]
    tm = _pick_tile(M, TM_CAP, 16)
    tf = _pick_tile(d_ff, TK_CAP, 128)
    acc_in_out = (x.dtype == jnp.float32)
    scratch = [pltpu.VMEM((tm, d), MXU_DTYPE)]
    if not acc_in_out:
        scratch.append(pltpu.VMEM((tm, d), jnp.float32))
    y = pl.pallas_call(
        functools.partial(_ffn_kernel, eps=eps, acc_in_out=acc_in_out),
        out_shape=jax.ShapeDtypeStruct((M, d), x.dtype),
        grid=(M // tm, d_ff // tf),
        in_specs=[
            pl.BlockSpec((tm, d), lambda i, f: (i, 0)),    # x
            pl.BlockSpec((1, d), lambda i, f: (0, 0)),     # alpha
            pl.BlockSpec((1, d), lambda i, f: (0, 0)),     # norm bias
            pl.BlockSpec((d, tf), lambda i, f: (0, f)),    # w1
            pl.BlockSpec((1, tf), lambda i, f: (0, f)),    # b1
            pl.BlockSpec((tf, d), lambda i, f: (f, 0)),    # w2
            pl.BlockSpec((1, d), lambda i, f: (0, 0)),     # b2
            pl.BlockSpec((tm, d), lambda i, f: (i, 0)),    # residual
        ],
        out_specs=pl.BlockSpec((tm, d), lambda i, f: (i, 0)),
        scratch_shapes=scratch,
        compiler_params=pltpu.CompilerParams(
            dimension_semantics=("parallel", "arbitrary"),
            vmem_limit_bytes=VMEM_LIMIT),
    )(x.reshape(M, d),
      norm_p["alpha"].reshape(1, d), norm_p["bias"].reshape(1, d),
      p["l1"]["w"], p["l1"]["b"].reshape(1, d_ff),
      p["l2"]["w"], p["l2"]["b"].reshape(1, d),
      residual.reshape(M, d))
    return y.reshape(bs, s, d)


# ----------------------------------------------------------- attention core --
def _attn_kernel(q_ref, kv_ref, m_ref, o_ref, *, heads, d_k, scale):
    d_model = heads * d_k
    # Additive mask bias computed once (hoisted out of the head loop);
    # masked_fill(mask == 1, -1e9) semantics.
    neg_bias = jnp.where(m_ref[...] == 1, -1e9, 0.0).astype(jnp.float32)
    q = q_ref[...].astype(jnp.float32) * scale       # scale folded into Q
    kv = kv_ref[...]                                  # (Sk, 2*d_model)  [K | V]
    outs = []
    # TODO(synk): flash-style Sk tiling (online softmax) and a heads-batched
    # dot_general for long sequences / many heads; whole-Sk scores only fit
    # VMEM at moderate sequence lengths.
    for h in range(heads):                            # static unroll (small h)
        qh = q[:, h * d_k:(h + 1) * d_k].astype(MXU_DTYPE)
        kh = kv[:, h * d_k:(h + 1) * d_k].astype(MXU_DTYPE)
        vh = kv[:, d_model + h * d_k:d_model + (h + 1) * d_k].astype(MXU_DTYPE)
        # contract last dims directly (no explicit transpose)
        s = jax.lax.dot_general(qh, kh, (((1,), (1,)), ((), ())),
                                preferred_element_type=jnp.float32) + neg_bias
        s = s - jnp.max(s, axis=-1, keepdims=True)
        p = jnp.exp(s)
        p = p * pl.reciprocal(jnp.sum(p, axis=-1, keepdims=True), approx=True)
        outs.append(jnp.dot(p.astype(MXU_DTYPE), vh,
                            preferred_element_type=jnp.float32))
    # single lane-dense store in "concat" layout (tq, d_model)
    o_ref[...] = jnp.concatenate(outs, axis=-1).astype(o_ref.dtype)


def attention_core(q, kv, mask, heads, d_k):
    """q: (bs, Sq, d_model); kv: (bs, Sk, 2*d_model); mask: (bs|1, 1, Sq, Sk).
    Grid over (batch, Sq tiles); KV stays resident across the Sq axis."""
    bs, sq, d_model = q.shape
    sk = kv.shape[1]
    scale = 1.0 / math.sqrt(d_k)
    tq = _pick_tile(sq, TM_CAP, 8)
    mb = mask.shape[0]
    if mb == bs:
        mask_idx = lambda b, i: (b, 0, i, 0)
    else:                                            # broadcast over batch
        mask_idx = lambda b, i: (0, 0, i, 0)
    return pl.pallas_call(
        functools.partial(_attn_kernel, heads=heads, d_k=d_k, scale=scale),
        out_shape=jax.ShapeDtypeStruct((bs, sq, d_model), q.dtype),
        grid=(bs, sq // tq),
        in_specs=[
            pl.BlockSpec((None, tq, d_model), lambda b, i: (b, i, 0)),
            pl.BlockSpec((None, sk, 2 * d_model), lambda b, i: (b, 0, 0)),
            pl.BlockSpec((None, None, tq, sk), mask_idx),  # original int mask
        ],
        out_specs=pl.BlockSpec((None, tq, d_model), lambda b, i: (b, i, 0)),
        compiler_params=pltpu.CompilerParams(
            dimension_semantics=("parallel", "parallel"),
            vmem_limit_bytes=VMEM_LIMIT),
    )(q, kv, mask)


# ------------------------------------------------------- MultiHeadAttention --
def mha(p, q_in, kv_in, mask, heads, q_norm=None, kv_norm=None, residual=None):
    bs, sq, d_model = q_in.shape
    sk = kv_in.shape[1]
    d_k = d_model // heads
    q2d = q_in.reshape(-1, d_model)
    kv2d = kv_in.reshape(-1, d_model)

    if q_norm is not None:
        q = norm_linear(q2d, q_norm, p["q"]["w"], p["q"]["b"])
    else:
        q = linear(q2d, p["q"]["w"], p["q"]["b"])
    # K and V projections share one pre-fused (d_model, 2*d_model) weight.
    if kv_norm is not None:
        kv = norm_linear(kv2d, kv_norm, p["kv"]["w"], p["kv"]["b"])
    else:
        kv = linear(kv2d, p["kv"]["w"], p["kv"]["b"])

    attn = attention_core(q.reshape(bs, sq, d_model),
                          kv.reshape(bs, sk, 2 * d_model),
                          mask, heads, d_k)                 # (bs, sq, d_model)

    res2d = None if residual is None else residual.reshape(-1, d_model)
    out = linear(attn.reshape(-1, d_model), p["out"]["w"], p["out"]["b"],
                 residual=res2d)
    return out.reshape(bs, sq, d_model)


# --------------------------------------------------------------- DecoderLayer
def decoder_layer_forward(params, x, e_outputs, src_mask, trg_mask, heads):
    # All dropouts are identity in eval-mode forward.
    # x = x + attn_1(norm_1(x), norm_1(x), norm_1(x), trg_mask)
    x = mha(params["attn1"], x, x, trg_mask, heads,
            q_norm=params["norm1"], kv_norm=params["norm1"], residual=x)
    # x = attn_2(e_outputs, norm_2(x), norm_2(x), src_mask)   (no residual)
    x = mha(params["attn2"], e_outputs, x, src_mask, heads,
            q_norm=None, kv_norm=params["norm2"], residual=None)
    # x = x + ff(norm_3(x))
    x = feed_forward(params["ff"], params["norm3"], x, residual=x)
    return x


# ---------------------------------------------------------------------- init -
def _init_linear(key, d_in, d_out, w_dtype=MXU_DTYPE):
    kw, kb = jax.random.split(key)
    bound = 1.0 / math.sqrt(d_in)
    return {
        "w": jax.random.uniform(kw, (d_in, d_out), jnp.float32,
                                -bound, bound).astype(w_dtype),
        "b": jax.random.uniform(kb, (d_out,), jnp.float32, -bound, bound),
    }


def make_params(key, d_model, d_ff):
    ks = jax.random.split(key, 10)

    def norm_p():
        return {"alpha": jnp.ones((d_model,), jnp.float32),
                "bias": jnp.zeros((d_model,), jnp.float32)}

    def mha_p(k0, k1, k2, k3):
        q = _init_linear(k0, d_model, d_model)
        k = _init_linear(k1, d_model, d_model)
        v = _init_linear(k2, d_model, d_model)
        out = _init_linear(k3, d_model, d_model)
        # Pre-fused K|V projection (built once, not per forward).
        kv = {"w": jnp.concatenate([k["w"], v["w"]], axis=1),
              "b": jnp.concatenate([k["b"], v["b"]], axis=0)}
        return {"q": q, "kv": kv, "out": out}

    return {
        "norm1": norm_p(), "norm2": norm_p(), "norm3": norm_p(),
        "attn1": mha_p(ks[0], ks[1], ks[2], ks[3]),
        "attn2": mha_p(ks[4], ks[5], ks[6], ks[7]),
        "ff": {"l1": _init_linear(ks[8], d_model, d_ff),
               "l2": _init_linear(ks[9], d_ff, d_model)},
    }


if __name__ == "__main__":
    bs, seq, d_model, heads, d_ff = 2, 8, 32, 4, 2048
    key = jax.random.PRNGKey(0)
    k_params, k_x, k_e = jax.random.split(key, 3)

    params = make_params(k_params, d_model, d_ff)
    x = jax.random.normal(k_x, (bs, seq, d_model), jnp.float32)
    e_outputs = jax.random.normal(k_e, (bs, seq, d_model), jnp.float32)

    # masks follow the PyTorch convention in this module: value 1 == masked
    trg_mask = jnp.broadcast_to(
        jnp.triu(jnp.ones((seq, seq), jnp.int32), k=1)[None, None],
        (bs, 1, seq, seq))
    src_mask = jnp.zeros((bs, 1, seq, seq), jnp.int32)

    fwd = jax.jit(decoder_layer_forward, static_argnums=(5,))
    out = fwd(params, x, e_outputs, src_mask, trg_mask, heads)
    jax.block_until_ready(out)
    assert out.shape == (bs, seq, d_model)
    print("KERNEL_OK")
</pallas_src>

<mosaic_0001>
module attributes {stable_mosaic.version = 11 : i64} {
  func.func @_norm_linear_kernel(%arg0: i32, %arg1: i32, %arg2: memref<16x32xf32, #tpu.memory_space<vmem>>, %arg3: memref<1x32xf32, #tpu.memory_space<vmem>>, %arg4: memref<1x32xf32, #tpu.memory_space<vmem>>, %arg5: memref<32x32xbf16, #tpu.memory_space<vmem>>, %arg6: memref<1x32xf32, #tpu.memory_space<vmem>>, %arg7: memref<16x32xf32, #tpu.memory_space<vmem>>, %arg8: memref<16x32xbf16, #tpu.memory_space<vmem>>) attributes {dimension_semantics = [#tpu.dimension_semantics<parallel>, #tpu.dimension_semantics<arbitrary>], iteration_bounds = array<i64: 1, 1>, scalar_prefetch = 0 : i64, scratch_operands = 1 : i64, tpu.core_type = #tpu.core_type<tc>, window_params = [{transform_indices = @transform_0, window_bounds = array<i64: 16, 32>}, {pipeline_mode = #tpu.pipeline_mode<synchronous>, transform_indices = @transform_1, window_bounds = array<i64: 1, 32>}, {pipeline_mode = #tpu.pipeline_mode<synchronous>, transform_indices = @transform_2, window_bounds = array<i64: 1, 32>}, {transform_indices = @transform_3, window_bounds = array<i64: 32, 32>}, {transform_indices = @transform_4, window_bounds = array<i64: 1, 32>}, {transform_indices = @transform_5, window_bounds = array<i64: 16, 32>}]} {
    %c0_i32 = arith.constant 0 : i32
    %0 = arith.cmpi eq, %arg1, %c0_i32 : i32
    %1 = arith.extui %0 : i1 to i32
    %c0_i32_0 = arith.constant 0 : i32
    %2 = arith.cmpi ne, %1, %c0_i32_0 : i32
    scf.if %2 {
      %c0_8 = arith.constant 0 : index
      %c0_9 = arith.constant 0 : index
      %10 = vector.load %arg2[%c0_8, %c0_9] : memref<16x32xf32, #tpu.memory_space<vmem>>, vector<16x32xf32>
      %cst_10 = arith.constant dense<0.000000e+00> : vector<16xf32>
      %11 = vector.multi_reduction <add>, %10, %cst_10 [1] : vector<16x32xf32> to vector<16xf32>
      %12 = vector.shape_cast %11 : vector<16xf32> to vector<16x1xf32>
      %cst_11 = arith.constant 3.200000e+01 : f32
      %13 = vector.broadcast %cst_11 : f32 to vector<16x1xf32>
      %14 = arith.divf %12, %13 : vector<16x1xf32>
      %15 = vector.broadcast %14 : vector<16x1xf32> to vector<16x32xf32>
      %16 = arith.subf %10, %15 : vector<16x32xf32>
      %17 = arith.mulf %16, %16 : vector<16x32xf32>
      %cst_12 = arith.constant dense<0.000000e+00> : vector<16xf32>
      %18 = vector.multi_reduction <add>, %17, %cst_12 [1] : vector<16x32xf32> to vector<16xf32>
      %19 = vector.shape_cast %18 : vector<16xf32> to vector<16x1xf32>
      %cst_13 = arith.constant 3.100000e+01 : f32
      %20 = vector.broadcast %cst_13 : f32 to vector<16x1xf32>
      %21 = arith.divf %19, %20 : vector<16x1xf32>
      %22 = math.sqrt %21 : vector<16x1xf32>
      %cst_14 = arith.constant 9.99999997E-7 : f32
      %23 = vector.broadcast %cst_14 : f32 to vector<16x1xf32>
      %24 = arith.addf %22, %23 : vector<16x1xf32>
      %25 = tpu.reciprocal %24 {approx = true} : vector<16x1xf32> -> vector<16x1xf32>
      %c0_15 = arith.constant 0 : index
      %c0_16 = arith.constant 0 : index
      %26 = vector.load %arg3[%c0_15, %c0_16] : memref<1x32xf32, #tpu.memory_space<vmem>>, vector<1x32xf32>
      %27 = vector.broadcast %26 : vector<1x32xf32> to vector<16x32xf32>
      %28 = arith.mulf %27, %16 : vector<16x32xf32>
      %29 = vector.broadcast %25 : vector<16x1xf32> to vector<16x32xf32>
      %30 = arith.mulf %28, %29 : vector<16x32xf32>
      %c0_17 = arith.constant 0 : index
      %c0_18 = arith.constant 0 : index
      %31 = vector.load %arg4[%c0_17, %c0_18] : memref<1x32xf32, #tpu.memory_space<vmem>>, vector<1x32xf32>
      %32 = vector.broadcast %31 : vector<1x32xf32> to vector<16x32xf32>
      %33 = arith.addf %30, %32 : vector<16x32xf32>
      %34 = arith.truncf %33 : vector<16x32xf32> to vector<16x32xbf16>
      %c0_19 = arith.constant 0 : index
      %c0_20 = arith.constant 0 : index
      %35 = vector.load %arg8[%c0_19, %c0_20] : memref<16x32xbf16, #tpu.memory_space<vmem>>, vector<16x32xbf16>
      tpu.vector_store %arg8[%c0_19, %c0_20], %34 {strides = array<i32>} : memref<16x32xbf16, #tpu.memory_space<vmem>>, vector<16x32xbf16>,
    } else {
    }
    %c0 = arith.constant 0 : index
    %c0_1 = arith.constant 0 : index
    %3 = vector.load %arg8[%c0, %c0_1] : memref<16x32xbf16, #tpu.memory_space<vmem>>, vector<16x32xbf16>
    %c0_2 = arith.constant 0 : index
    %c0_3 = arith.constant 0 : index
    %4 = vector.load %arg5[%c0_2, %c0_3] : memref<32x32xbf16, #tpu.memory_space<vmem>>, vector<32x32xbf16>
    %cst = arith.constant dense<0.000000e+00> : vector<16x32xf32>
    %5 = tpu.matmul %3, %4, %cst {dimension_numbers = #tpu.dot_dimension_numbers<[1], [0], [0], [1], [0, 0, 1, 1], [], []>} : vector<16x32xbf16>, vector<32x32xbf16>, vector<16x32xf32> -> vector<16x32xf32>
    %c0_4 = arith.constant 0 : index
    %c0_5 = arith.constant 0 : index
    %6 = vector.load %arg6[%c0_4, %c0_5] : memref<1x32xf32, #tpu.memory_space<vmem>>, vector<1x32xf32>
    %7 = vector.broadcast %6 : vector<1x32xf32> to vector<16x32xf32>
    %8 = arith.addf %5, %7 : vector<16x32xf32>
    %c0_6 = arith.constant 0 : index
    %c0_7 = arith.constant 0 : index
    %9 = vector.load %arg7[%c0_6, %c0_7] : memref<16x32xf32, #tpu.memory_space<vmem>>, vector<16x32xf32>
    tpu.vector_store %arg7[%c0_6, %c0_7], %8 {strides = array<i32>} : memref<16x32xf32, #tpu.memory_space<vmem>>, vector<16x32xf32>,
    return
  }
  func.func @transform_0(%arg0: i32, %arg1: i32) -> (i32, i32) {
    %c0_i32 = arith.constant 0 : i32
    %c0_i32_0 = arith.constant 0 : i32
    return %arg0, %c0_i32 : i32, i32
  }
  func.func @transform_1(%arg0: i32, %arg1: i32) -> (i32, i32) {
    %c0_i32 = arith.constant 0 : i32
    %c0_i32_0 = arith.constant 0 : i32
    %c0_i32_1 = arith.constant 0 : i32
    return %c0_i32, %c0_i32_0 : i32, i32
  }
  func.func @transform_2(%arg0: i32, %arg1: i32) -> (i32, i32) {
    %c0_i32 = arith.constant 0 : i32
    %c0_i32_0 = arith.constant 0 : i32
    %c0_i32_1 = arith.constant 0 : i32
    return %c0_i32, %c0_i32_0 : i32, i32
  }
  func.func @transform_3(%arg0: i32, %arg1: i32) -> (i32, i32) {
    %c0_i32 = arith.constant 0 : i32
    %c0_i32_0 = arith.constant 0 : i32
    return %c0_i32, %arg1 : i32, i32
  }
  func.func @transform_4(%arg0: i32, %arg1: i32) -> (i32, i32) {
    %c0_i32 = arith.constant 0 : i32
    %c0_i32_0 = arith.constant 0 : i32
    return %c0_i32, %arg1 : i32, i32
  }
  func.func @transform_5(%arg0: i32, %arg1: i32) -> (i32, i32) {
    %c0_i32 = arith.constant 0 : i32
    return %arg0, %arg1 : i32, i32
  }
}

module attributes {stable_mosaic.version = 11 : i64} {
  func.func @_norm_linear_kernel(%arg0: i32, %arg1: i32, %arg2: memref<16x32xf32, #tpu.memory_space<vmem>>, %arg3: memref<1x32xf32, #tpu.memory_space<vmem>>, %arg4: memref<1x32xf32, #tpu.memory_space<vmem>>, %arg5: memref<32x64xbf16, #tpu.memory_space<vmem>>, %arg6: memref<1x64xf32, #tpu.memory_space<vmem>>, %arg7: memref<16x64xf32, #tpu.memory_space<vmem>>, %arg8: memref<16x32xbf16, #tpu.memory_space<vmem>>) attributes {dimension_semantics = [#tpu.dimension_semantics<parallel>, #tpu.dimension_semantics<arbitrary>], iteration_bounds = array<i64: 1, 1>, scalar_prefetch = 0 : i64, scratch_operands = 1 : i64, tpu.core_type = #tpu.core_type<tc>, window_params = [{transform_indices = @transform_0, window_bounds = array<i64: 16, 32>}, {pipeline_mode = #tpu.pipeline_mode<synchronous>, transform_indices = @transform_1, window_bounds = array<i64: 1, 32>}, {pipeline_mode = #tpu.pipeline_mode<synchronous>, transform_indices = @transform_2, window_bounds = array<i64: 1, 32>}, {transform_indices = @transform_3, window_bounds = array<i64: 32, 64>}, {transform_indices = @transform_4, window_bounds = array<i64: 1, 64>}, {transform_indices = @transform_5, window_bounds = array<i64: 16, 64>}]} {
    %c0_i32 = arith.constant 0 : i32
    %0 = arith.cmpi eq, %arg1, %c0_i32 : i32
    %1 = arith.extui %0 : i1 to i32
    %c0_i32_0 = arith.constant 0 : i32
    %2 = arith.cmpi ne, %1, %c0_i32_0 : i32
    scf.if %2 {
      %c0_8 = arith.constant 0 : index
      %c0_9 = arith.constant 0 : index
      %10 = vector.load %arg2[%c0_8, %c0_9] : memref<16x32xf32, #tpu.memory_space<vmem>>, vector<16x32xf32>
      %cst_10 = arith.constant dense<0.000000e+00> : vector<16xf32>
      %11 = vector.multi_reduction <add>, %10, %cst_10 [1] : vector<16x32xf32> to vector<16xf32>
      %12 = vector.shape_cast %11 : vector<16xf32> to vector<16x1xf32>
      %cst_11 = arith.constant 3.200000e+01 : f32
      %13 = vector.broadcast %cst_11 : f32 to vector<16x1xf32>
      %14 = arith.divf %12, %13 : vector<16x1xf32>
      %15 = vector.broadcast %14 : vector<16x1xf32> to vector<16x32xf32>
      %16 = arith.subf %10, %15 : vector<16x32xf32>
      %17 = arith.mulf %16, %16 : vector<16x32xf32>
      %cst_12 = arith.constant dense<0.000000e+00> : vector<16xf32>
      %18 = vector.multi_reduction <add>, %17, %cst_12 [1] : vector<16x32xf32> to vector<16xf32>
      %19 = vector.shape_cast %18 : vector<16xf32> to vector<16x1xf32>
      %cst_13 = arith.constant 3.100000e+01 : f32
      %20 = vector.broadcast %cst_13 : f32 to vector<16x1xf32>
      %21 = arith.divf %19, %20 : vector<16x1xf32>
      %22 = math.sqrt %21 : vector<16x1xf32>
      %cst_14 = arith.constant 9.99999997E-7 : f32
      %23 = vector.broadcast %cst_14 : f32 to vector<16x1xf32>
      %24 = arith.addf %22, %23 : vector<16x1xf32>
      %25 = tpu.reciprocal %24 {approx = true} : vector<16x1xf32> -> vector<16x1xf32>
      %c0_15 = arith.constant 0 : index
      %c0_16 = arith.constant 0 : index
      %26 = vector.load %arg3[%c0_15, %c0_16] : memref<1x32xf32, #tpu.memory_space<vmem>>, vector<1x32xf32>
      %27 = vector.broadcast %26 : vector<1x32xf32> to vector<16x32xf32>
      %28 = arith.mulf %27, %16 : vector<16x32xf32>
      %29 = vector.broadcast %25 : vector<16x1xf32> to vector<16x32xf32>
      %30 = arith.mulf %28, %29 : vector<16x32xf32>
      %c0_17 = arith.constant 0 : index
      %c0_18 = arith.constant 0 : index
      %31 = vector.load %arg4[%c0_17, %c0_18] : memref<1x32xf32, #tpu.memory_space<vmem>>, vector<1x32xf32>
      %32 = vector.broadcast %31 : vector<1x32xf32> to vector<16x32xf32>
      %33 = arith.addf %30, %32 : vector<16x32xf32>
      %34 = arith.truncf %33 : vector<16x32xf32> to vector<16x32xbf16>
      %c0_19 = arith.constant 0 : index
      %c0_20 = arith.constant 0 : index
      %35 = vector.load %arg8[%c0_19, %c0_20] : memref<16x32xbf16, #tpu.memory_space<vmem>>, vector<16x32xbf16>
      tpu.vector_store %arg8[%c0_19, %c0_20], %34 {strides = array<i32>} : memref<16x32xbf16, #tpu.memory_space<vmem>>, vector<16x32xbf16>,
    } else {
    }
    %c0 = arith.constant 0 : index
    %c0_1 = arith.constant 0 : index
    %3 = vector.load %arg8[%c0, %c0_1] : memref<16x32xbf16, #tpu.memory_space<vmem>>, vector<16x32xbf16>
    %c0_2 = arith.constant 0 : index
    %c0_3 = arith.constant 0 : index
    %4 = vector.load %arg5[%c0_2, %c0_3] : memref<32x64xbf16, #tpu.memory_space<vmem>>, vector<32x64xbf16>
    %cst = arith.constant dense<0.000000e+00> : vector<16x64xf32>
    %5 = tpu.matmul %3, %4, %cst {dimension_numbers = #tpu.dot_dimension_numbers<[1], [0], [0], [1], [0, 0, 1, 1], [], []>} : vector<16x32xbf16>, vector<32x64xbf16>, vector<16x64xf32> -> vector<16x64xf32>
    %c0_4 = arith.constant 0 : index
    %c0_5 = arith.constant 0 : index
    %6 = vector.load %arg6[%c0_4, %c0_5] : memref<1x64xf32, #tpu.memory_space<vmem>>, vector<1x64xf32>
    %7 = vector.broadcast %6 : vector<1x64xf32> to vector<16x64xf32>
    %8 = arith.addf %5, %7 : vector<16x64xf32>
    %c0_6 = arith.constant 0 : index
    %c0_7 = arith.constant 0 : index
    %9 = vector.load %arg7[%c0_6, %c0_7] : memref<16x64xf32, #tpu.memory_space<vmem>>, vector<16x64xf32>
    tpu.vector_store %arg7[%c0_6, %c0_7], %8 {strides = array<i32>} : memref<16x64xf32, #tpu.memory_space<vmem>>, vector<16x64xf32>,
    return
  }
  func.func @transform_0(%arg0: i32, %arg1: i32) -> (i32, i32) {
    %c0_i32 = arith.constant 0 : i32
    %c0_i32_0 = arith.constant 0 : i32
    return %arg0, %c0_i32 : i32, i32
  }
  func.func @transform_1(%arg0: i32, %arg1: i32) -> (i32, i32) {
    %c0_i32 = arith.constant 0 : i32
    %c0_i32_0 = arith.constant 0 : i32
    %c0_i32_1 = arith.constant 0 : i32
    return %c0_i32, %c0_i32_0 : i32, i32
  }
  func.func @transform_2(%arg0: i32, %arg1: i32) -> (i32, i32) {
    %c0_i32 = arith.constant 0 : i32
    %c0_i32_0 = arith.constant 0 : i32
    %c0_i32_1 = arith.constant 0 : i32
    return %c0_i32, %c0_i32_0 : i32, i32
  }
  func.func @transform_3(%arg0: i32, %arg1: i32) -> (i32, i32) {
    %c0_i32 = arith.constant 0 : i32
    %c0_i32_0 = arith.constant 0 : i32
    return %c0_i32, %arg1 : i32, i32
  }
  func.func @transform_4(%arg0: i32, %arg1: i32) -> (i32, i32) {
    %c0_i32 = arith.constant 0 : i32
    %c0_i32_0 = arith.constant 0 : i32
    return %c0_i32, %arg1 : i32, i32
  }
  func.func @transform_5(%arg0: i32, %arg1: i32) -> (i32, i32) {
    %c0_i32 = arith.constant 0 : i32
    return %arg0, %arg1 : i32, i32
  }
}

module attributes {stable_mosaic.version = 11 : i64} {
  func.func @_linear_kernel(%arg0: i32, %arg1: i32, %arg2: i32, %arg3: memref<16x32xf32, #tpu.memory_space<vmem>>, %arg4: memref<32x32xbf16, #tpu.memory_space<vmem>>, %arg5: memref<1x32xf32, #tpu.memory_space<vmem>>, %arg6: memref<16x32xf32, #tpu.memory_space<vmem>>, %arg7: memref<16x32xf32, #tpu.memory_space<vmem>>) attributes {dimension_semantics = [#tpu.dimension_semantics<parallel>, #tpu.dimension_semantics<parallel>, #tpu.dimension_semantics<arbitrary>], iteration_bounds = array<i64: 1, 1, 1>, scalar_prefetch = 0 : i64, scratch_operands = 0 : i64, tpu.core_type = #tpu.core_type<tc>, window_params = [{transform_indices = @transform_0, window_bounds = array<i64: 16, 32>}, {transform_indices = @transform_1, window_bounds = array<i64: 32, 32>}, {transform_indices = @transform_2, window_bounds = array<i64: 1, 32>}, {transform_indices = @transform_3, window_bounds = array<i64: 16, 32>}, {transform_indices = @transform_4, window_bounds = array<i64: 16, 32>}]} {
    %c0_i32 = arith.constant 0 : i32
    %0 = arith.cmpi eq, %arg2, %c0_i32 : i32
    %1 = arith.extui %0 : i1 to i32
    %c0_i32_0 = arith.constant 0 : i32
    %2 = arith.cmpi ne, %1, %c0_i32_0 : i32
    scf.if %2 {
      %cst_10 = arith.constant 0.000000e+00 : f32
      %13 = vector.broadcast %cst_10 : f32 to vector<16x32xf32>
      %c0_11 = arith.constant 0 : index
      %c0_12 = arith.constant 0 : index
      %14 = vector.load %arg7[%c0_11, %c0_12] : memref<16x32xf32, #tpu.memory_space<vmem>>, vector<16x32xf32>
      tpu.vector_store %arg7[%c0_11, %c0_12], %13 {strides = array<i32>} : memref<16x32xf32, #tpu.memory_space<vmem>>, vector<16x32xf32>,
    } else {
    }
    %c0 = arith.constant 0 : index
    %c0_1 = arith.constant 0 : index
    %3 = vector.load %arg7[%c0, %c0_1] : memref<16x32xf32, #tpu.memory_space<vmem>>, vector<16x32xf32>
    %c0_2 = arith.constant 0 : index
    %c0_3 = arith.constant 0 : index
    %4 = vector.load %arg3[%c0_2, %c0_3] : memref<16x32xf32, #tpu.memory_space<vmem>>, vector<16x32xf32>
    %5 = arith.truncf %4 : vector<16x32xf32> to vector<16x32xbf16>
    %c0_4 = arith.constant 0 : index
    %c0_5 = arith.constant 0 : index
    %6 = vector.load %arg4[%c0_4, %c0_5] : memref<32x32xbf16, #tpu.memory_space<vmem>>, vector<32x32xbf16>
    %cst = arith.constant dense<0.000000e+00> : vector<16x32xf32>
    %7 = tpu.matmul %5, %6, %cst {dimension_numbers = #tpu.dot_dimension_numbers<[1], [0], [0], [1], [0, 0, 1, 1], [], []>} : vector<16x32xbf16>, vector<32x32xbf16>, vector<16x32xf32> -> vector<16x32xf32>
    %8 = arith.addf %3, %7 : vector<16x32xf32>
    %c0_6 = arith.constant 0 : index
    %c0_7 = arith.constant 0 : index
    %9 = vector.load %arg7[%c0_6, %c0_7] : memref<16x32xf32, #tpu.memory_space<vmem>>, vector<16x32xf32>
    tpu.vector_store %arg7[%c0_6, %c0_7], %8 {strides = array<i32>} : memref<16x32xf32, #tpu.memory_space<vmem>>, vector<16x32xf32>,
    %c0_i32_8 = arith.constant 0 : i32
    %10 = arith.cmpi eq, %arg2, %c0_i32_8 : i32
    %11 = arith.extui %10 : i1 to i32
    %c0_i32_9 = arith.constant 0 : i32
    %12 = arith.cmpi ne, %11, %c0_i32_9 : i32
    scf.if %12 {
      %c0_10 = arith.constant 0 : index
      %c0_11 = arith.constant 0 : index
      %13 = vector.load %arg7[%c0_10, %c0_11] : memref<16x32xf32, #tpu.memory_space<vmem>>, vector<16x32xf32>
      %c0_12 = arith.constant 0 : index
      %c0_13 = arith.constant 0 : index
      %14 = vector.load %arg5[%c0_12, %c0_13] : memref<1x32xf32, #tpu.memory_space<vmem>>, vector<1x32xf32>
      %15 = vector.broadcast %14 : vector<1x32xf32> to vector<16x32xf32>
      %16 = arith.addf %13, %15 : vector<16x32xf32>
      %c0_14 = arith.constant 0 : index
      %c0_15 = arith.constant 0 : index
      %17 = vector.load %arg6[%c0_14, %c0_15] : memref<16x32xf32, #tpu.memory_space<vmem>>, vector<16x32xf32>
      %18 = arith.addf %16, %17 : vector<16x32xf32>
      %c0_16 = arith.constant 0 : index
      %c0_17 = arith.constant 0 : index
      %19 = vector.load %arg7[%c0_16, %c0_17] : memref<16x32xf32, #tpu.memory_space<vmem>>, vector<16x32xf32>
      tpu.vector_store %arg7[%c0_16, %c0_17], %18 {strides = array<i32>} : memref<16x32xf32, #tpu.memory_space<vmem>>, vector<16x32xf32>,
    } else {
    }
    return
  }
  func.func @transform_0(%arg0: i32, %arg1: i32, %arg2: i32) -> (i32, i32) {
    %c0_i32 = arith.constant 0 : i32
    return %arg0, %arg2 : i32, i32
  }
  func.func @transform_1(%arg0: i32, %arg1: i32, %arg2: i32) -> (i32, i32) {
    %c0_i32 = arith.constant 0 : i32
    return %arg2, %arg1 : i32, i32
  }
  func.func @transform_2(%arg0: i32, %arg1: i32, %arg2: i32) -> (i32, i32) {
    %c0_i32 = arith.constant 0 : i32
    %c0_i32_0 = arith.constant 0 : i32
    return %c0_i32, %arg1 : i32, i32
  }
  func.func @transform_3(%arg0: i32, %arg1: i32, %arg2: i32) -> (i32, i32) {
    %c0_i32 = arith.constant 0 : i32
    return %arg0, %arg1 : i32, i32
  }
  func.func @transform_4(%arg0: i32, %arg1: i32, %arg2: i32) -> (i32, i32) {
    %c0_i32 = arith.constant 0 : i32
    return %arg0, %arg1 : i32, i32
  }
}

module attributes {stable_mosaic.version = 11 : i64} {
  func.func @_attn_kernel(%arg0: i32, %arg1: i32, %arg2: memref<1x8x32xf32, #tpu.memory_space<vmem>>, %arg3: memref<1x8x64xf32, #tpu.memory_space<vmem>>, %arg4: memref<1x1x8x8xi32, #tpu.memory_space<vmem>>, %arg5: memref<1x8x32xf32, #tpu.memory_space<vmem>>) attributes {dimension_semantics = [#tpu.dimension_semantics<parallel>, #tpu.dimension_semantics<parallel>], iteration_bounds = array<i64: 2, 1>, scalar_prefetch = 0 : i64, scratch_operands = 0 : i64, tpu.core_type = #tpu.core_type<tc>, window_params = [{transform_indices = @transform_0, window_bounds = array<i64: 1, 8, 32>}, {transform_indices = @transform_1, window_bounds = array<i64: 1, 8, 64>}, {transform_indices = @transform_2, window_bounds = array<i64: 1, 1, 8, 8>}, {transform_indices = @transform_3, window_bounds = array<i64: 1, 8, 32>}]} {
    %c0 = arith.constant 0 : index
    %c0_0 = arith.constant 0 : index
    %c0_1 = arith.constant 0 : index
    %c0_2 = arith.constant 0 : index
    %0 = vector.load %arg4[%c0, %c0_0, %c0_1, %c0_2] : memref<1x1x8x8xi32, #tpu.memory_space<vmem>>, vector<1x1x8x8xi32>
    %1 = vector.shape_cast %0 : vector<1x1x8x8xi32> to vector<8x8xi32>
    %c1_i32 = arith.constant 1 : i32
    %2 = vector.broadcast %c1_i32 : i32 to vector<8x8xi32>
    %3 = arith.cmpi eq, %1, %2 : vector<8x8xi32>
    %cst = arith.constant -1.000000e+09 : f32
    %cst_3 = arith.constant 0.000000e+00 : f32
    %4 = vector.broadcast %cst : f32 to vector<8x8xf32>
    %5 = vector.broadcast %cst_3 : f32 to vector<8x8xf32>
    %6 = arith.select %3, %4, %5 : vector<8x8xi1>, vector<8x8xf32>
    %c0_4 = arith.constant 0 : index
    %c0_5 = arith.constant 0 : index
    %c0_6 = arith.constant 0 : index
    %7 = vector.load %arg2[%c0_4, %c0_5, %c0_6] : memref<1x8x32xf32, #tpu.memory_space<vmem>>, vector<1x8x32xf32>
    %8 = vector.shape_cast %7 : vector<1x8x32xf32> to vector<8x32xf32>
    %cst_7 = arith.constant 0.353553385 : f32
    %9 = vector.broadcast %cst_7 : f32 to vector<8x32xf32>
    %10 = arith.mulf %8, %9 : vector<8x32xf32>
    %c0_8 = arith.constant 0 : index
    %c0_9 = arith.constant 0 : index
    %c0_10 = arith.constant 0 : index
    %11 = vector.load %arg3[%c0_8, %c0_9, %c0_10] : memref<1x8x64xf32, #tpu.memory_space<vmem>>, vector<1x8x64xf32>
    %12 = vector.shape_cast %11 : vector<1x8x64xf32> to vector<8x64xf32>
    %13 = vector.extract_strided_slice %10 {offsets = [0, 0], sizes = [8, 8], strides = [1, 1]} : vector<8x32xf32> to vector<8x8xf32>
    %14 = arith.truncf %13 : vector<8x8xf32> to vector<8x8xbf16>
    %15 = vector.extract_strided_slice %12 {offsets = [0, 0], sizes = [8, 8], strides = [1, 1]} : vector<8x64xf32> to vector<8x8xf32>
    %16 = arith.truncf %15 : vector<8x8xf32> to vector<8x8xbf16>
    %17 = vector.extract_strided_slice %12 {offsets = [0, 32], sizes = [8, 8], strides = [1, 1]} : vector<8x64xf32> to vector<8x8xf32>
    %18 = arith.truncf %17 : vector<8x8xf32> to vector<8x8xbf16>
    %cst_11 = arith.constant dense<0.000000e+00> : vector<8x8xf32>
    %19 = tpu.matmul %14, %16, %cst_11 {dimension_numbers = #tpu.dot_dimension_numbers<[1], [1], [0], [0], [0, 0, 1, 0], [], []>} : vector<8x8xbf16>, vector<8x8xbf16>, vector<8x8xf32> -> vector<8x8xf32>
    %20 = arith.addf %19, %6 : vector<8x8xf32>
    %cst_12 = arith.constant dense<0xFF800000> : vector<8xf32>
    %21 = vector.multi_reduction <maximumf>, %20, %cst_12 [1] : vector<8x8xf32> to vector<8xf32>
    %22 = vector.shape_cast %21 : vector<8xf32> to vector<8x1xf32>
    %23 = vector.broadcast %22 : vector<8x1xf32> to vector<8x8xf32>
    %24 = arith.subf %20, %23 : vector<8x8xf32>
    %25 = math.exp %24 : vector<8x8xf32>
    %cst_13 = arith.constant dense<0.000000e+00> : vector<8xf32>
    %26 = vector.multi_reduction <add>, %25, %cst_13 [1] : vector<8x8xf32> to vector<8xf32>
    %27 = vector.shape_cast %26 : vector<8xf32> to vector<8x1xf32>
    %28 = tpu.reciprocal %27 {approx = true} : vector<8x1xf32> -> vector<8x1xf32>
    %29 = vector.broadcast %28 : vector<8x1xf32> to vector<8x8xf32>
    %30 = arith.mulf %25, %29 : vector<8x8xf32>
    %31 = arith.truncf %30 : vector<8x8xf32> to vector<8x8xbf16>
    %cst_14 = arith.constant dense<0.000000e+00> : vector<8x8xf32>
    %32 = tpu.matmul %31, %18, %cst_14 {dimension_numbers = #tpu.dot_dimension_numbers<[1], [0], [0], [1], [0, 0, 1, 1], [], []>} : vector<8x8xbf16>, vector<8x8xbf16>, vector<8x8xf32> -> vector<8x8xf32>
    %33 = vector.extract_strided_slice %10 {offsets = [0, 8], sizes = [8, 8], strides = [1, 1]} : vector<8x32xf32> to vector<8x8xf32>
    %34 = arith.truncf %33 : vector<8x8xf32> to vector<8x8xbf16>
    %35 = vector.extract_strided_slice %12 {offsets = [0, 8], sizes = [8, 8], strides = [1, 1]} : vector<8x64xf32> to vector<8x8xf32>
    %36 = arith.truncf %35 : vector<8x8xf32> to vector<8x8xbf16>
    %37 = vector.extract_strided_slice %12 {offsets = [0, 40], sizes = [8, 8], strides = [1, 1]} : vector<8x64xf32> to vector<8x8xf32>
    %38 = arith.truncf %37 : vector<8x8xf32> to vector<8x8xbf16>
    %cst_15 = arith.constant dense<0.000000e+00> : vector<8x8xf32>
    %39 = tpu.matmul %34, %36, %cst_15 {dimension_numbers = #tpu.dot_dimension_numbers<[1], [1], [0], [0], [0, 0, 1, 0], [], []>} : vector<8x8xbf16>, vector<8x8xbf16>, vector<8x8xf32> -> vector<8x8xf32>
    %40 = arith.addf %39, %6 : vector<8x8xf32>
    %cst_16 = arith.constant dense<0xFF800000> : vector<8xf32>
    %41 = vector.multi_reduction <maximumf>, %40, %cst_16 [1] : vector<8x8xf32> to vector<8xf32>
    %42 = vector.shape_cast %41 : vector<8xf32> to vector<8x1xf32>
    %43 = vector.broadcast %42 : vector<8x1xf32> to vector<8x8xf32>
    %44 = arith.subf %40, %43 : vector<8x8xf32>
    %45 = math.exp %44 : vector<8x8xf32>
    %cst_17 = arith.constant dense<0.000000e+00> : vector<8xf32>
    %46 = vector.multi_reduction <add>, %45, %cst_17 [1] : vector<8x8xf32> to vector<8xf32>
    %47 = vector.shape_cast %46 : vector<8xf32> to vector<8x1xf32>
    %48 = tpu.reciprocal %47 {approx = true} : vector<8x1xf32> -> vector<8x1xf32>
    %49 = vector.broadcast %48 : vector<8x1xf32> to vector<8x8xf32>
    %50 = arith.mulf %45, %49 : vector<8x8xf32>
    %51 = arith.truncf %50 : vector<8x8xf32> to vector<8x8xbf16>
    %cst_18 = arith.constant dense<0.000000e+00> : vector<8x8xf32>
    %52 = tpu.matmul %51, %38, %cst_18 {dimension_numbers = #tpu.dot_dimension_numbers<[1], [0], [0], [1], [0, 0, 1, 1], [], []>} : vector<8x8xbf16>, vector<8x8xbf16>, vector<8x8xf32> -> vector<8x8xf32>
    %53 = vector.extract_strided_slice %10 {offsets = [0, 16], sizes = [8, 8], strides = [1, 1]} : vector<8x32xf32> to vector<8x8xf32>
    %54 = arith.truncf %53 : vector<8x8xf32> to vector<8x8xbf16>
    %55 = vector.extract_strided_slice %12 {offsets = [0, 16], sizes = [8, 8], strides = [1, 1]} : vector<8x64xf32> to vector<8x8xf32>
    %56 = arith.truncf %55 : vector<8x8xf32> to vector<8x8xbf16>
    %57 = vector.extract_strided_slice %12 {offsets = [0, 48], sizes = [8, 8], strides = [1, 1]} : vector<8x64xf32> to vector<8x8xf32>
    %58 = arith.truncf %57 : vector<8x8xf32> to vector<8x8xbf16>
    %cst_19 = arith.constant dense<0.000000e+00> : vector<8x8xf32>
    %59 = tpu.matmul %54, %56, %cst_19 {dimension_numbers = #tpu.dot_dimension_numbers<[1], [1], [0], [0], [0, 0, 1, 0], [], []>} : vector<8x8xbf16>, vector<8x8xbf16>, vector<8x8xf32> -> vector<8x8xf32>
    %60 = arith.addf %59, %6 : vector<8x8xf32>
    %cst_20 = arith.constant dense<0xFF800000> : vector<8xf32>
    %61 = vector.multi_reduction <maximumf>, %60, %cst_20 [1] : vector<8x8xf32> to vector<8xf32>
    %62 = vector.shape_cast %61 : vector<8xf32> to vector<8x1xf32>
    %63 = vector.broadcast %62 : vector<8x1xf32> to vector<8x8xf32>
    %64 = arith.subf %60, %63 : vector<8x8xf32>
    %65 = math.exp %64 : vector<8x8xf32>
    %cst_21 = arith.constant dense<0.000000e+00> : vector<8xf32>
    %66 = vector.multi_reduction <add>, %65, %cst_21 [1] : vector<8x8xf32> to vector<8xf32>
    %67 = vector.shape_cast %66 : vector<8xf32> to vector<8x1xf32>
    %68 = tpu.reciprocal %67 {approx = true} : vector<8x1xf32> -> vector<8x1xf32>
    %69 = vector.broadcast %68 : vector<8x1xf32> to vector<8x8xf32>
    %70 = arith.mulf %65, %69 : vector<8x8xf32>
    %71 = arith.truncf %70 : vector<8x8xf32> to vector<8x8xbf16>
    %cst_22 = arith.constant dense<0.000000e+00> : vector<8x8xf32>
    %72 = tpu.matmul %71, %58, %cst_22 {dimension_numbers = #tpu.dot_dimension_numbers<[1], [0], [0], [1], [0, 0, 1, 1], [], []>} : vector<8x8xbf16>, vector<8x8xbf16>, vector<8x8xf32> -> vector<8x8xf32>
    %73 = vector.extract_strided_slice %10 {offsets = [0, 24], sizes = [8, 8], strides = [1, 1]} : vector<8x32xf32> to vector<8x8xf32>
    %74 = arith.truncf %73 : vector<8x8xf32> to vector<8x8xbf16>
    %75 = vector.extract_strided_slice %12 {offsets = [0, 24], sizes = [8, 8], strides = [1, 1]} : vector<8x64xf32> to vector<8x8xf32>
    %76 = arith.truncf %75 : vector<8x8xf32> to vector<8x8xbf16>
    %77 = vector.extract_strided_slice %12 {offsets = [0, 56], sizes = [8, 8], strides = [1, 1]} : vector<8x64xf32> to vector<8x8xf32>
    %78 = arith.truncf %77 : vector<8x8xf32> to vector<8x8xbf16>
    %cst_23 = arith.constant dense<0.000000e+00> : vector<8x8xf32>
    %79 = tpu.matmul %74, %76, %cst_23 {dimension_numbers = #tpu.dot_dimension_numbers<[1], [1], [0], [0], [0, 0, 1, 0], [], []>} : vector<8x8xbf16>, vector<8x8xbf16>, vector<8x8xf32> -> vector<8x8xf32>
    %80 = arith.addf %79, %6 : vector<8x8xf32>
    %cst_24 = arith.constant dense<0xFF800000> : vector<8xf32>
    %81 = vector.multi_reduction <maximumf>, %80, %cst_24 [1] : vector<8x8xf32> to vector<8xf32>
    %82 = vector.shape_cast %81 : vector<8xf32> to vector<8x1xf32>
    %83 = vector.broadcast %82 : vector<8x1xf32> to vector<8x8xf32>
    %84 = arith.subf %80, %83 : vector<8x8xf32>
    %85 = math.exp %84 : vector<8x8xf32>
    %cst_25 = arith.constant dense<0.000000e+00> : vector<8xf32>
    %86 = vector.multi_reduction <add>, %85, %cst_25 [1] : vector<8x8xf32> to vector<8xf32>
    %87 = vector.shape_cast %86 : vector<8xf32> to vector<8x1xf32>
    %88 = tpu.reciprocal %87 {approx = true} : vector<8x1xf32> -> vector<8x1xf32>
    %89 = vector.broadcast %88 : vector<8x1xf32> to vector<8x8xf32>
    %90 = arith.mulf %85, %89 : vector<8x8xf32>
    %91 = arith.truncf %90 : vector<8x8xf32> to vector<8x8xbf16>
    %cst_26 = arith.constant dense<0.000000e+00> : vector<8x8xf32>
    %92 = tpu.matmul %91, %78, %cst_26 {dimension_numbers = #tpu.dot_dimension_numbers<[1], [0], [0], [1], [0, 0, 1, 1], [], []>} : vector<8x8xbf16>, vector<8x8xbf16>, vector<8x8xf32> -> vector<8x8xf32>
    %93 = tpu.concatenate %32, %52, %72, %92 in 1 : vector<8x8xf32>, vector<8x8xf32>, vector<8x8xf32>, vector<8x8xf32> -> vector<8x32xf32>
    %c0_27 = arith.constant 0 : index
    %c0_28 = arith.constant 0 : index
    %c0_29 = arith.constant 0 : index
    %94 = vector.load %arg5[%c0_27, %c0_28, %c0_29] : memref<1x8x32xf32, #tpu.memory_space<vmem>>, vector<1x8x32xf32>
    %95 = vector.shape_cast %94 : vector<1x8x32xf32> to vector<8x32xf32>
    %96 = vector.shape_cast %93 : vector<8x32xf32> to vector<1x8x32xf32>
    tpu.vector_store %arg5[%c0_27, %c0_28, %c0_29], %96 {strides = array<i32>} : memref<1x8x32xf32, #tpu.memory_space<vmem>>, vector<1x8x32xf32>,
    return
  }
  func.func @transform_0(%arg0: i32, %arg1: i32) -> (i32, i32, i32) {
    %c0_i32 = arith.constant 0 : i32
    %c0_i32_0 = arith.constant 0 : i32
    return %arg0, %arg1, %c0_i32 : i32, i32, i32
  }
  func.func @transform_1(%arg0: i32, %arg1: i32) -> (i32, i32, i32) {
    %c0_i32 = arith.constant 0 : i32
    %c0_i32_0 = arith.constant 0 : i32
    %c0_i32_1 = arith.constant 0 : i32
    return %arg0, %c0_i32, %c0_i32_0 : i32, i32, i32
  }
  func.func @transform_2(%arg0: i32, %arg1: i32) -> (i32, i32, i32, i32) {
    %c0_i32 = arith.constant 0 : i32
    %c0_i32_0 = arith.constant 0 : i32
    %c0_i32_1 = arith.constant 0 : i32
    return %arg0, %c0_i32, %arg1, %c0_i32_0 : i32, i32, i32, i32
  }
  func.func @transform_3(%arg0: i32, %arg1: i32) -> (i32, i32, i32) {
    %c0_i32 = arith.constant 0 : i32
    %c0_i32_0 = arith.constant 0 : i32
    return %arg0, %arg1, %c0_i32 : i32, i32, i32
  }
}

module attributes {stable_mosaic.version = 11 : i64} {
  func.func @_linear_kernel(%arg0: i32, %arg1: i32, %arg2: i32, %arg3: memref<16x32xf32, #tpu.memory_space<vmem>>, %arg4: memref<32x32xbf16, #tpu.memory_space<vmem>>, %arg5: memref<1x32xf32, #tpu.memory_space<vmem>>, %arg6: memref<16x32xf32, #tpu.memory_space<vmem>>) attributes {dimension_semantics = [#tpu.dimension_semantics<parallel>, #tpu.dimension_semantics<parallel>, #tpu.dimension_semantics<arbitrary>], iteration_bounds = array<i64: 1, 1, 1>, scalar_prefetch = 0 : i64, scratch_operands = 0 : i64, tpu.core_type = #tpu.core_type<tc>, window_params = [{transform_indices = @transform_0, window_bounds = array<i64: 16, 32>}, {transform_indices = @transform_1, window_bounds = array<i64: 32, 32>}, {transform_indices = @transform_2, window_bounds = array<i64: 1, 32>}, {transform_indices = @transform_3, window_bounds = array<i64: 16, 32>}]} {
    %c0_i32 = arith.constant 0 : i32
    %0 = arith.cmpi eq, %arg2, %c0_i32 : i32
    %1 = arith.extui %0 : i1 to i32
    %c0_i32_0 = arith.constant 0 : i32
    %2 = arith.cmpi ne, %1, %c0_i32_0 : i32
    scf.if %2 {
      %cst_10 = arith.constant 0.000000e+00 : f32
      %13 = vector.broadcast %cst_10 : f32 to vector<16x32xf32>
      %c0_11 = arith.constant 0 : index
      %c0_12 = arith.constant 0 : index
      %14 = vector.load %arg6[%c0_11, %c0_12] : memref<16x32xf32, #tpu.memory_space<vmem>>, vector<16x32xf32>
      tpu.vector_store %arg6[%c0_11, %c0_12], %13 {strides = array<i32>} : memref<16x32xf32, #tpu.memory_space<vmem>>, vector<16x32xf32>,
    } else {
    }
    %c0 = arith.constant 0 : index
    %c0_1 = arith.constant 0 : index
    %3 = vector.load %arg6[%c0, %c0_1] : memref<16x32xf32, #tpu.memory_space<vmem>>, vector<16x32xf32>
    %c0_2 = arith.constant 0 : index
    %c0_3 = arith.constant 0 : index
    %4 = vector.load %arg3[%c0_2, %c0_3] : memref<16x32xf32, #tpu.memory_space<vmem>>, vector<16x32xf32>
    %5 = arith.truncf %4 : vector<16x32xf32> to vector<16x32xbf16>
    %c0_4 = arith.constant 0 : index
    %c0_5 = arith.constant 0 : index
    %6 = vector.load %arg4[%c0_4, %c0_5] : memref<32x32xbf16, #tpu.memory_space<vmem>>, vector<32x32xbf16>
    %cst = arith.constant dense<0.000000e+00> : vector<16x32xf32>
    %7 = tpu.matmul %5, %6, %cst {dimension_numbers = #tpu.dot_dimension_numbers<[1], [0], [0], [1], [0, 0, 1, 1], [], []>} : vector<16x32xbf16>, vector<32x32xbf16>, vector<16x32xf32> -> vector<16x32xf32>
    %8 = arith.addf %3, %7 : vector<16x32xf32>
    %c0_6 = arith.constant 0 : index
    %c0_7 = arith.constant 0 : index
    %9 = vector.load %arg6[%c0_6, %c0_7] : memref<16x32xf32, #tpu.memory_space<vmem>>, vector<16x32xf32>
    tpu.vector_store %arg6[%c0_6, %c0_7], %8 {strides = array<i32>} : memref<16x32xf32, #tpu.memory_space<vmem>>, vector<16x32xf32>,
    %c0_i32_8 = arith.constant 0 : i32
    %10 = arith.cmpi eq, %arg2, %c0_i32_8 : i32
    %11 = arith.extui %10 : i1 to i32
    %c0_i32_9 = arith.constant 0 : i32
    %12 = arith.cmpi ne, %11, %c0_i32_9 : i32
    scf.if %12 {
      %c0_10 = arith.constant 0 : index
      %c0_11 = arith.constant 0 : index
      %13 = vector.load %arg6[%c0_10, %c0_11] : memref<16x32xf32, #tpu.memory_space<vmem>>, vector<16x32xf32>
      %c0_12 = arith.constant 0 : index
      %c0_13 = arith.constant 0 : index
      %14 = vector.load %arg5[%c0_12, %c0_13] : memref<1x32xf32, #tpu.memory_space<vmem>>, vector<1x32xf32>
      %15 = vector.broadcast %14 : vector<1x32xf32> to vector<16x32xf32>
      %16 = arith.addf %13, %15 : vector<16x32xf32>
      %c0_14 = arith.constant 0 : index
      %c0_15 = arith.constant 0 : index
      %17 = vector.load %arg6[%c0_14, %c0_15] : memref<16x32xf32, #tpu.memory_space<vmem>>, vector<16x32xf32>
      tpu.vector_store %arg6[%c0_14, %c0_15], %16 {strides = array<i32>} : memref<16x32xf32, #tpu.memory_space<vmem>>, vector<16x32xf32>,
    } else {
    }
    return
  }
  func.func @transform_0(%arg0: i32, %arg1: i32, %arg2: i32) -> (i32, i32) {
    %c0_i32 = arith.constant 0 : i32
    return %arg0, %arg2 : i32, i32
  }
  func.func @transform_1(%arg0: i32, %arg1: i32, %arg2: i32) -> (i32, i32) {
    %c0_i32 = arith.constant 0 : i32
    return %arg2, %arg1 : i32, i32
  }
  func.func @transform_2(%arg0: i32, %arg1: i32, %arg2: i32) -> (i32, i32) {
    %c0_i32 = arith.constant 0 : i32
    %c0_i32_0 = arith.constant 0 : i32
    return %c0_i32, %arg1 : i32, i32
  }
  func.func @transform_3(%arg0: i32, %arg1: i32, %arg2: i32) -> (i32, i32) {
    %c0_i32 = arith.constant 0 : i32
    return %arg0, %arg1 : i32, i32
  }
}

module attributes {stable_mosaic.version = 11 : i64} {
  func.func @_norm_linear_kernel(%arg0: i32, %arg1: i32, %arg2: memref<16x32xf32, #tpu.memory_space<vmem>>, %arg3: memref<1x32xf32, #tpu.memory_space<vmem>>, %arg4: memref<1x32xf32, #tpu.memory_space<vmem>>, %arg5: memref<32x64xbf16, #tpu.memory_space<vmem>>, %arg6: memref<1x64xf32, #tpu.memory_space<vmem>>, %arg7: memref<16x64xf32, #tpu.memory_space<vmem>>, %arg8: memref<16x32xbf16, #tpu.memory_space<vmem>>) attributes {dimension_semantics = [#tpu.dimension_semantics<parallel>, #tpu.dimension_semantics<arbitrary>], iteration_bounds = array<i64: 1, 1>, scalar_prefetch = 0 : i64, scratch_operands = 1 : i64, tpu.core_type = #tpu.core_type<tc>, window_params = [{transform_indices = @transform_0, window_bounds = array<i64: 16, 32>}, {pipeline_mode = #tpu.pipeline_mode<synchronous>, transform_indices = @transform_1, window_bounds = array<i64: 1, 32>}, {pipeline_mode = #tpu.pipeline_mode<synchronous>, transform_indices = @transform_2, window_bounds = array<i64: 1, 32>}, {transform_indices = @transform_3, window_bounds = array<i64: 32, 64>}, {transform_indices = @transform_4, window_bounds = array<i64: 1, 64>}, {transform_indices = @transform_5, window_bounds = array<i64: 16, 64>}]} {
    %c0_i32 = arith.constant 0 : i32
    %0 = arith.cmpi eq, %arg1, %c0_i32 : i32
    %1 = arith.extui %0 : i1 to i32
    %c0_i32_0 = arith.constant 0 : i32
    %2 = arith.cmpi ne, %1, %c0_i32_0 : i32
    scf.if %2 {
      %c0_8 = arith.constant 0 : index
      %c0_9 = arith.constant 0 : index
      %10 = vector.load %arg2[%c0_8, %c0_9] : memref<16x32xf32, #tpu.memory_space<vmem>>, vector<16x32xf32>
      %cst_10 = arith.constant dense<0.000000e+00> : vector<16xf32>
      %11 = vector.multi_reduction <add>, %10, %cst_10 [1] : vector<16x32xf32> to vector<16xf32>
      %12 = vector.shape_cast %11 : vector<16xf32> to vector<16x1xf32>
      %cst_11 = arith.constant 3.200000e+01 : f32
      %13 = vector.broadcast %cst_11 : f32 to vector<16x1xf32>
      %14 = arith.divf %12, %13 : vector<16x1xf32>
      %15 = vector.broadcast %14 : vector<16x1xf32> to vector<16x32xf32>
      %16 = arith.subf %10, %15 : vector<16x32xf32>
      %17 = arith.mulf %16, %16 : vector<16x32xf32>
      %cst_12 = arith.constant dense<0.000000e+00> : vector<16xf32>
      %18 = vector.multi_reduction <add>, %17, %cst_12 [1] : vector<16x32xf32> to vector<16xf32>
      %19 = vector.shape_cast %18 : vector<16xf32> to vector<16x1xf32>
      %cst_13 = arith.constant 3.100000e+01 : f32
      %20 = vector.broadcast %cst_13 : f32 to vector<16x1xf32>
      %21 = arith.divf %19, %20 : vector<16x1xf32>
      %22 = math.sqrt %21 : vector<16x1xf32>
      %cst_14 = arith.constant 9.99999997E-7 : f32
      %23 = vector.broadcast %cst_14 : f32 to vector<16x1xf32>
      %24 = arith.addf %22, %23 : vector<16x1xf32>
      %25 = tpu.reciprocal %24 {approx = true} : vector<16x1xf32> -> vector<16x1xf32>
      %c0_15 = arith.constant 0 : index
      %c0_16 = arith.constant 0 : index
      %26 = vector.load %arg3[%c0_15, %c0_16] : memref<1x32xf32, #tpu.memory_space<vmem>>, vector<1x32xf32>
      %27 = vector.broadcast %26 : vector<1x32xf32> to vector<16x32xf32>
      %28 = arith.mulf %27, %16 : vector<16x32xf32>
      %29 = vector.broadcast %25 : vector<16x1xf32> to vector<16x32xf32>
      %30 = arith.mulf %28, %29 : vector<16x32xf32>
      %c0_17 = arith.constant 0 : index
      %c0_18 = arith.constant 0 : index
      %31 = vector.load %arg4[%c0_17, %c0_18] : memref<1x32xf32, #tpu.memory_space<vmem>>, vector<1x32xf32>
      %32 = vector.broadcast %31 : vector<1x32xf32> to vector<16x32xf32>
      %33 = arith.addf %30, %32 : vector<16x32xf32>
      %34 = arith.truncf %33 : vector<16x32xf32> to vector<16x32xbf16>
      %c0_19 = arith.constant 0 : index
      %c0_20 = arith.constant 0 : index
      %35 = vector.load %arg8[%c0_19, %c0_20] : memref<16x32xbf16, #tpu.memory_space<vmem>>, vector<16x32xbf16>
      tpu.vector_store %arg8[%c0_19, %c0_20], %34 {strides = array<i32>} : memref<16x32xbf16, #tpu.memory_space<vmem>>, vector<16x32xbf16>,
    } else {
    }
    %c0 = arith.constant 0 : index
    %c0_1 = arith.constant 0 : index
    %3 = vector.load %arg8[%c0, %c0_1] : memref<16x32xbf16, #tpu.memory_space<vmem>>, vector<16x32xbf16>
    %c0_2 = arith.constant 0 : index
    %c0_3 = arith.constant 0 : index
    %4 = vector.load %arg5[%c0_2, %c0_3] : memref<32x64xbf16, #tpu.memory_space<vmem>>, vector<32x64xbf16>
    %cst = arith.constant dense<0.000000e+00> : vector<16x64xf32>
    %5 = tpu.matmul %3, %4, %cst {dimension_numbers = #tpu.dot_dimension_numbers<[1], [0], [0], [1], [0, 0, 1, 1], [], []>} : vector<16x32xbf16>, vector<32x64xbf16>, vector<16x64xf32> -> vector<16x64xf32>
    %c0_4 = arith.constant 0 : index
    %c0_5 = arith.constant 0 : index
    %6 = vector.load %arg6[%c0_4, %c0_5] : memref<1x64xf32, #tpu.memory_space<vmem>>, vector<1x64xf32>
    %7 = vector.broadcast %6 : vector<1x64xf32> to vector<16x64xf32>
    %8 = arith.addf %5, %7 : vector<16x64xf32>
    %c0_6 = arith.constant 0 : index
    %c0_7 = arith.constant 0 : index
    %9 = vector.load %arg7[%c0_6, %c0_7] : memref<16x64xf32, #tpu.memory_space<vmem>>, vector<16x64xf32>
    tpu.vector_store %arg7[%c0_6, %c0_7], %8 {strides = array<i32>} : memref<16x64xf32, #tpu.memory_space<vmem>>, vector<16x64xf32>,
    return
  }
  func.func @transform_0(%arg0: i32, %arg1: i32) -> (i32, i32) {
    %c0_i32 = arith.constant 0 : i32
    %c0_i32_0 = arith.constant 0 : i32
    return %arg0, %c0_i32 : i32, i32
  }
  func.func @transform_1(%arg0: i32, %arg1: i32) -> (i32, i32) {
    %c0_i32 = arith.constant 0 : i32
    %c0_i32_0 = arith.constant 0 : i32
    %c0_i32_1 = arith.constant 0 : i32
    return %c0_i32, %c0_i32_0 : i32, i32
  }
  func.func @transform_2(%arg0: i32, %arg1: i32) -> (i32, i32) {
    %c0_i32 = arith.constant 0 : i32
    %c0_i32_0 = arith.constant 0 : i32
    %c0_i32_1 = arith.constant 0 : i32
    return %c0_i32, %c0_i32_0 : i32, i32
  }
  func.func @transform_3(%arg0: i32, %arg1: i32) -> (i32, i32) {
    %c0_i32 = arith.constant 0 : i32
    %c0_i32_0 = arith.constant 0 : i32
    return %c0_i32, %arg1 : i32, i32
  }
  func.func @transform_4(%arg0: i32, %arg1: i32) -> (i32, i32) {
    %c0_i32 = arith.constant 0 : i32
    %c0_i32_0 = arith.constant 0 : i32
    return %c0_i32, %arg1 : i32, i32
  }
  func.func @transform_5(%arg0: i32, %arg1: i32) -> (i32, i32) {
    %c0_i32 = arith.constant 0 : i32
    return %arg0, %arg1 : i32, i32
  }
}

module attributes {stable_mosaic.version = 11 : i64} {
  func.func @_ffn_kernel(%arg0: i32, %arg1: i32, %arg2: memref<16x32xf32, #tpu.memory_space<vmem>>, %arg3: memref<1x32xf32, #tpu.memory_space<vmem>>, %arg4: memref<1x32xf32, #tpu.memory_space<vmem>>, %arg5: memref<32x512xbf16, #tpu.memory_space<vmem>>, %arg6: memref<1x512xf32, #tpu.memory_space<vmem>>, %arg7: memref<512x32xbf16, #tpu.memory_space<vmem>>, %arg8: memref<1x32xf32, #tpu.memory_space<vmem>>, %arg9: memref<16x32xf32, #tpu.memory_space<vmem>>, %arg10: memref<16x32xf32, #tpu.memory_space<vmem>>, %arg11: memref<16x32xbf16, #tpu.memory_space<vmem>>) attributes {dimension_semantics = [#tpu.dimension_semantics<parallel>, #tpu.dimension_semantics<arbitrary>], iteration_bounds = array<i64: 1, 4>, scalar_prefetch = 0 : i64, scratch_operands = 1 : i64, tpu.core_type = #tpu.core_type<tc>, window_params = [{transform_indices = @transform_0, window_bounds = array<i64: 16, 32>}, {pipeline_mode = #tpu.pipeline_mode<synchronous>, transform_indices = @transform_1, window_bounds = array<i64: 1, 32>}, {pipeline_mode = #tpu.pipeline_mode<synchronous>, transform_indices = @transform_2, window_bounds = array<i64: 1, 32>}, {transform_indices = @transform_3, window_bounds = array<i64: 32, 512>}, {transform_indices = @transform_4, window_bounds = array<i64: 1, 512>}, {transform_indices = @transform_5, window_bounds = array<i64: 512, 32>}, {pipeline_mode = #tpu.pipeline_mode<synchronous>, transform_indices = @transform_6, window_bounds = array<i64: 1, 32>}, {transform_indices = @transform_7, window_bounds = array<i64: 16, 32>}, {transform_indices = @transform_8, window_bounds = array<i64: 16, 32>}]} {
    %c0_i32 = arith.constant 0 : i32
    %0 = arith.cmpi eq, %arg1, %c0_i32 : i32
    %1 = arith.extui %0 : i1 to i32
    %c0_i32_0 = arith.constant 0 : i32
    %2 = arith.cmpi ne, %1, %c0_i32_0 : i32
    scf.if %2 {
      %c0_15 = arith.constant 0 : index
      %c0_16 = arith.constant 0 : index
      %20 = vector.load %arg2[%c0_15, %c0_16] : memref<16x32xf32, #tpu.memory_space<vmem>>, vector<16x32xf32>
      %cst_17 = arith.constant dense<0.000000e+00> : vector<16xf32>
      %21 = vector.multi_reduction <add>, %20, %cst_17 [1] : vector<16x32xf32> to vector<16xf32>
      %22 = vector.shape_cast %21 : vector<16xf32> to vector<16x1xf32>
      %cst_18 = arith.constant 3.200000e+01 : f32
      %23 = vector.broadcast %cst_18 : f32 to vector<16x1xf32>
      %24 = arith.divf %22, %23 : vector<16x1xf32>
      %25 = vector.broadcast %24 : vector<16x1xf32> to vector<16x32xf32>
      %26 = arith.subf %20, %25 : vector<16x32xf32>
      %27 = arith.mulf %26, %26 : vector<16x32xf32>
      %cst_19 = arith.constant dense<0.000000e+00> : vector<16xf32>
      %28 = vector.multi_reduction <add>, %27, %cst_19 [1] : vector<16x32xf32> to vector<16xf32>
      %29 = vector.shape_cast %28 : vector<16xf32> to vector<16x1xf32>
      %cst_20 = arith.constant 3.100000e+01 : f32
      %30 = vector.broadcast %cst_20 : f32 to vector<16x1xf32>
      %31 = arith.divf %29, %30 : vector<16x1xf32>
      %32 = math.sqrt %31 : vector<16x1xf32>
      %cst_21 = arith.constant 9.99999997E-7 : f32
      %33 = vector.broadcast %cst_21 : f32 to vector<16x1xf32>
      %34 = arith.addf %32, %33 : vector<16x1xf32>
      %35 = tpu.reciprocal %34 {approx = true} : vector<16x1xf32> -> vector<16x1xf32>
      %c0_22 = arith.constant 0 : index
      %c0_23 = arith.constant 0 : index
      %36 = vector.load %arg3[%c0_22, %c0_23] : memref<1x32xf32, #tpu.memory_space<vmem>>, vector<1x32xf32>
      %37 = vector.broadcast %36 : vector<1x32xf32> to vector<16x32xf32>
      %38 = arith.mulf %37, %26 : vector<16x32xf32>
      %39 = vector.broadcast %35 : vector<16x1xf32> to vector<16x32xf32>
      %40 = arith.mulf %38, %39 : vector<16x32xf32>
      %c0_24 = arith.constant 0 : index
      %c0_25 = arith.constant 0 : index
      %41 = vector.load %arg4[%c0_24, %c0_25] : memref<1x32xf32, #tpu.memory_space<vmem>>, vector<1x32xf32>
      %42 = vector.broadcast %41 : vector<1x32xf32> to vector<16x32xf32>
      %43 = arith.addf %40, %42 : vector<16x32xf32>
      %44 = arith.truncf %43 : vector<16x32xf32> to vector<16x32xbf16>
      %c0_26 = arith.constant 0 : index
      %c0_27 = arith.constant 0 : index
      %45 = vector.load %arg11[%c0_26, %c0_27] : memref<16x32xbf16, #tpu.memory_space<vmem>>, vector<16x32xbf16>
      tpu.vector_store %arg11[%c0_26, %c0_27], %44 {strides = array<i32>} : memref<16x32xbf16, #tpu.memory_space<vmem>>, vector<16x32xbf16>,
      %cst_28 = arith.constant 0.000000e+00 : f32
      %46 = vector.broadcast %cst_28 : f32 to vector<16x32xf32>
      %c0_29 = arith.constant 0 : index
      %c0_30 = arith.constant 0 : index
      %47 = vector.load %arg10[%c0_29, %c0_30] : memref<16x32xf32, #tpu.memory_space<vmem>>, vector<16x32xf32>
      tpu.vector_store %arg10[%c0_29, %c0_30], %46 {strides = array<i32>} : memref<16x32xf32, #tpu.memory_space<vmem>>, vector<16x32xf32>,
    } else {
    }
    %c0 = arith.constant 0 : index
    %c0_1 = arith.constant 0 : index
    %3 = vector.load %arg11[%c0, %c0_1] : memref<16x32xbf16, #tpu.memory_space<vmem>>, vector<16x32xbf16>
    %c0_2 = arith.constant 0 : index
    %c0_3 = arith.constant 0 : index
    %4 = vector.load %arg5[%c0_2, %c0_3] : memref<32x512xbf16, #tpu.memory_space<vmem>>, vector<32x512xbf16>
    %cst = arith.constant dense<0.000000e+00> : vector<16x512xf32>
    %5 = tpu.matmul %3, %4, %cst {dimension_numbers = #tpu.dot_dimension_numbers<[1], [0], [0], [1], [0, 0, 1, 1], [], []>} : vector<16x32xbf16>, vector<32x512xbf16>, vector<16x512xf32> -> vector<16x512xf32>
    %c0_4 = arith.constant 0 : index
    %c0_5 = arith.constant 0 : index
    %6 = vector.load %arg6[%c0_4, %c0_5] : memref<1x512xf32, #tpu.memory_space<vmem>>, vector<1x512xf32>
    %7 = vector.broadcast %6 : vector<1x512xf32> to vector<16x512xf32>
    %8 = arith.addf %5, %7 : vector<16x512xf32>
    %cst_6 = arith.constant 0.000000e+00 : f32
    %9 = vector.broadcast %cst_6 : f32 to vector<16x512xf32>
    %10 = arith.maximumf %8, %9 : vector<16x512xf32>
    %c0_7 = arith.constant 0 : index
    %c0_8 = arith.constant 0 : index
    %11 = vector.load %arg10[%c0_7, %c0_8] : memref<16x32xf32, #tpu.memory_space<vmem>>, vector<16x32xf32>
    %12 = arith.truncf %10 : vector<16x512xf32> to vector<16x512xbf16>
    %c0_9 = arith.constant 0 : index
    %c0_10 = arith.constant 0 : index
    %13 = vector.load %arg7[%c0_9, %c0_10] : memref<512x32xbf16, #tpu.memory_space<vmem>>, vector<512x32xbf16>
    %cst_11 = arith.constant dense<0.000000e+00> : vector<16x32xf32>
    %14 = tpu.matmul %12, %13, %cst_11 {dimension_numbers = #tpu.dot_dimension_numbers<[1], [0], [0], [1], [0, 0, 1, 1], [], []>} : vector<16x512xbf16>, vector<512x32xbf16>, vector<16x32xf32> -> vector<16x32xf32>
    %15 = arith.addf %11, %14 : vector<16x32xf32>
    %c0_12 = arith.constant 0 : index
    %c0_13 = arith.constant 0 : index
    %16 = vector.load %arg10[%c0_12, %c0_13] : memref<16x32xf32, #tpu.memory_space<vmem>>, vector<16x32xf32>
    tpu.vector_store %arg10[%c0_12, %c0_13], %15 {strides = array<i32>} : memref<16x32xf32, #tpu.memory_space<vmem>>, vector<16x32xf32>,
    %c3_i32 = arith.constant 3 : i32
    %17 = arith.cmpi eq, %arg1, %c3_i32 : i32
    %18 = arith.extui %17 : i1 to i32
    %c0_i32_14 = arith.constant 0 : i32
    %19 = arith.cmpi ne, %18, %c0_i32_14 : i32
    scf.if %19 {
      %c0_15 = arith.constant 0 : index
      %c0_16 = arith.constant 0 : index
      %20 = vector.load %arg10[%c0_15, %c0_16] : memref<16x32xf32, #tpu.memory_space<vmem>>, vector<16x32xf32>
      %c0_17 = arith.constant 0 : index
      %c0_18 = arith.constant 0 : index
      %21 = vector.load %arg8[%c0_17, %c0_18] : memref<1x32xf32, #tpu.memory_space<vmem>>, vector<1x32xf32>
      %22 = vector.broadcast %21 : vector<1x32xf32> to vector<16x32xf32>
      %23 = arith.addf %20, %22 : vector<16x32xf32>
      %c0_19 = arith.constant 0 : index
      %c0_20 = arith.constant 0 : index
      %24 = vector.load %arg9[%c0_19, %c0_20] : memref<16x32xf32, #tpu.memory_space<vmem>>, vector<16x32xf32>
      %25 = arith.addf %23, %24 : vector<16x32xf32>
      %c0_21 = arith.constant 0 : index
      %c0_22 = arith.constant 0 : index
      %26 = vector.load %arg10[%c0_21, %c0_22] : memref<16x32xf32, #tpu.memory_space<vmem>>, vector<16x32xf32>
      tpu.vector_store %arg10[%c0_21, %c0_22], %25 {strides = array<i32>} : memref<16x32xf32, #tpu.memory_space<vmem>>, vector<16x32xf32>,
    } else {
    }
    return
  }
  func.func @transform_0(%arg0: i32, %arg1: i32) -> (i32, i32) {
    %c0_i32 = arith.constant 0 : i32
    %c0_i32_0 = arith.constant 0 : i32
    return %arg0, %c0_i32 : i32, i32
  }
  func.func @transform_1(%arg0: i32, %arg1: i32) -> (i32, i32) {
    %c0_i32 = arith.constant 0 : i32
    %c0_i32_0 = arith.constant 0 : i32
    %c0_i32_1 = arith.constant 0 : i32
    return %c0_i32, %c0_i32_0 : i32, i32
  }
  func.func @transform_2(%arg0: i32, %arg1: i32) -> (i32, i32) {
    %c0_i32 = arith.constant 0 : i32
    %c0_i32_0 = arith.constant 0 : i32
    %c0_i32_1 = arith.constant 0 : i32
    return %c0_i32, %c0_i32_0 : i32, i32
  }
  func.func @transform_3(%arg0: i32, %arg1: i32) -> (i32, i32) {
    %c0_i32 = arith.constant 0 : i32
    %c0_i32_0 = arith.constant 0 : i32
    return %c0_i32, %arg1 : i32, i32
  }
  func.func @transform_4(%arg0: i32, %arg1: i32) -> (i32, i32) {
    %c0_i32 = arith.constant 0 : i32
    %c0_i32_0 = arith.constant 0 : i32
    return %c0_i32, %arg1 : i32, i32
  }
  func.func @transform_5(%arg0: i32, %arg1: i32) -> (i32, i32) {
    %c0_i32 = arith.constant 0 : i32
    %c0_i32_0 = arith.constant 0 : i32
    return %arg1, %c0_i32 : i32, i32
  }
  func.func @transform_6(%arg0: i32, %arg1: i32) -> (i32, i32) {
    %c0_i32 = arith.constant 0 : i32
    %c0_i32_0 = arith.constant 0 : i32
    %c0_i32_1 = arith.constant 0 : i32
    return %c0_i32, %c0_i32_0 : i32, i32
  }
  func.func @transform_7(%arg0: i32, %arg1: i32) -> (i32, i32) {
    %c0_i32 = arith.constant 0 : i32
    %c0_i32_0 = arith.constant 0 : i32
    return %arg0, %c0_i32 : i32, i32
  }
  func.func @transform_8(%arg0: i32, %arg1: i32) -> (i32, i32) {
    %c0_i32 = arith.constant 0 : i32
    %c0_i32_0 = arith.constant 0 : i32
    return %arg0, %c0_i32 : i32, i32
  }
}

</mosaic_0001>

<bundles_post_ra>
// kernel: decoder_layer_forward.12
= control target key start
LH: loop header
LB: loop body
LE: loop exit
PB: predicated region body
PF: predicated region fallthrough
CT: control target
= control target key end

     0   :  { %9 = vsyncpa [#allocation3], 0  ;;  %s300_s0 = inlined_call_operand.vmem [shape: f32[16,32], index: 0, kind: input, shape index: {}]   ;;  %s301_s1 = inlined_call_operand.hbm [shape: bf16[32,32], index: 1, kind: input, shape index: {}]   ;;  %s302_s2 = inlined_call_operand.hbm [shape: f32[1,32], index: 2, kind: input, shape index: {}]   ;;  %s303_s3 = inlined_call_operand.vmem [shape: f32[16,32], index: 3, kind: input, shape index: {}]   ;;  %s304_s4 = inlined_call_operand.vmem [shape: f32[16,32], index: 4, kind: output, shape index: {}]  }
   0x1   :  { %10 = vsyncpa [#allocation5], 0  ;;  %s214_s15 = smov [#allocation2]  }
   0x2   :  { %s18_s16 = sshll.u32 %s214_s15, 4  ;;  %s19_s16 = int_to_ptr.vmem [resolvable:$true] %s18_s16 }
   0x3   :  { %s178_s17 = scalar_lea.vmem %s19_s16, 256  ;;  %p183_p1 = scmp.lt.s32.totalorder %s19_s16, %s19_s16 }
   0x4   :  { %p179_p0 = scmp.ne.s32.totalorder %s19_s16, %s178_s17  ;;  %p184_p2 = scmp.lt.s32.totalorder %s178_s17, %s178_s17 }
   0x6   :  { %p185_p3 = por %p184_p2, %p183_p1 }
   0x8   :  { %p186_p4 = pnand %p185_p3, %p179_p0 }
   0xa   :  { %189 = shalt.err (!%p186_p4)
}
   0xb   :  { %s215_s18 = smov 64   ;;  %s216_s19 = smov 4  }
   0xc   :  { %24 = dma.hbm_to_vmem [thread:$0]  %s301_s1, 256, %s19_s16, [#allocation3], %s215_s18, %s215_s18, %s216_s19  }
   0xd   :  { %s217_s22 = smov [#allocation4]  }
   0xe   :  { %s31_s23 = sshll.u32 %s217_s22, 4  ;;  %s32_s23 = int_to_ptr.vmem [resolvable:$true] %s31_s23 }
   0xf   :  { %s198_s24 = scalar_lea.vmem %s32_s23, 16  ;;  %s202_s25 = scalar_lea.vmem %s32_s23, 32 }
  0x10   :  { %p199_p5 = scmp.ne.s32.totalorder %s32_s23, %s198_s24  ;;  %p203_p6 = scmp.lt.s32.totalorder %s32_s23, %s32_s23 }
  0x11   :  { %p204_p7 = scmp.lt.s32.totalorder %s202_s25, %s198_s24 }
  0x13   :  { %p205_p8 = por %p204_p7, %p203_p6 }
  0x15   :  { %p206_p9 = pnand %p205_p8, %p199_p5 }
  0x17   :  { %209 = shalt.err (!%p206_p9)
}
  0x18   :  { %34 = dma.hbm_to_vmem [thread:$0]  %s302_s2, 16, %s32_s23, [#allocation5]  }
  0x19   :  { %210 = dma.done.wait [#allocation3], 256  }
  0x1a   :  { %211 = vsyncadd [#allocation3], 4294967040 }
  0x1b   :  { %212 = dma.done.wait [#allocation5], 16  }
  0x1c   :  { %213 = vsyncadd [#allocation5], 4294967280  ;;  %vm48_vm0 = vcmask 261120   ;;  %v218_v0 = vmov 0.0   ;;  %vm219_vm1 = vmmov 0   ;;  %v168_v1 = vld [vmem:[#allocation2 + $0x8] sm:$0xff]  }
  0x1d   :  { %154 = vmatprep.subr.bf16.mxu0 %v218_v0  ;;  %158 = vmatprep.mubr.msk.bf16.mxu0 %vm219_vm1, %v218_v0  ;;  %49 = vst.msk [vmem:[%s304_s4] sm:$0xff] %vm48_vm0, %v218_v0  ;;  %50 = vst.msk [vmem:[%s304_s4 + $0x8] sm:$0xff] %vm48_vm0, %v218_v0  ;;  %v169_v2 = vld [vmem:[#allocation2] sm:$0xff]   ;;  %v54_v4 = vld [vmem:[%s300_s0 + $0x8] sm:$0xff] }
  0x1e   :  { %155 = vmatpush3.bf16.msra.mxu0 %v168_v1  ;;  %v53_v3 = vld [vmem:[%s300_s0] sm:$0xff]  ;;  %v150_v14 = vld [vmem:[#allocation4] ss:$0 sm:$0xff]  ;;  %v136_v20 = vld [vmem:[%s303_s3 + $0x8] sm:$0xff] }
  0x1f   :  { %156 = vmatprep.subr.bf16.mxu0 %v218_v0  ;;  %v55_v5 = vpack.c.bf16 %v54_v4, %v53_v3  ;;  %v135_v16 = vld [vmem:[%s303_s3] sm:$0xff] }
  0x22   :  { %157 = vmatpush3.bf16.msra.mxu0 %v169_v2 }
  0x24   :  { %v51_v6 = vld [vmem:[%s304_s4] sm:$0xff]  ;;  %v52_v10 = vld [vmem:[%s304_s4 + $0x8] sm:$0xff] }
  0x25   :  { %159 = vmatmul.mubr.msk.bf16.vlgmr.msra.gmra.mxu0 %vm48_vm0, %v55_v5 }
  0xe5   :  { %v110_v7 = vpop.f32.mrf.mxu0 }
  0xe6   :  { %v117_v8 = vadd.f32 %v110_v7, %v51_v6 }
  0xe7   :  { %v160_v9 = vpop.f32.mrf.mxu0 }
  0xe8   :  { %119 = vst.msk [vmem:[%s304_s4] sm:$0xff] %vm48_vm0, %v117_v8 }
  0xe9   :  { %v113_v11 = vpop.f32.mrf.mxu0 }
  0xea   :  { %v118_v12 = vadd.f32 %v113_v11, %v52_v10 }
  0xeb   :  { %v161_v13 = vpop.f32.mrf.mxu0 }
  0xec   :  { %120 = vst.msk [vmem:[%s304_s4 + $0x8] sm:$0xff] %vm48_vm0, %v118_v12 }
  0xef   :  { %v124_v15 = vld [vmem:[%s304_s4] sm:$0xff] }
  0xf0   :  { %v133_v17 = vadd.f32 %v150_v14, %v124_v15 }
  0xf2   :  { %v137_v18 = vadd.f32 %v135_v16, %v133_v17 }
  0xf3   :  { %v125_v19 = vld [vmem:[%s304_s4 + $0x8] sm:$0xff] }
  0xf4   :  { %139 = vst.msk [vmem:[%s304_s4] sm:$0xff] %vm48_vm0, %v137_v18  ;;  %v134_v21 = vadd.f32 %v150_v14, %v125_v19 }
  0xf6   :  { %v138_v22 = vadd.f32 %v136_v20, %v134_v21 }
  0xf8   :  { %140 = vst.msk [vmem:[%s304_s4 + $0x8] sm:$0xff] %vm48_vm0, %v138_v22 }
  0xf9   :  { %145 = vsyncpa [#allocation3], 1 }
  0xfa   :  { %146 = vsyncpa [#allocation5], 1 }

// kernel: decoder_layer_forward.9
= control target key start
LH: loop header
LB: loop body
LE: loop exit
PB: predicated region body
PF: predicated region fallthrough
CT: control target
= control target key end

     0   :  { %10 = vsyncpa [#allocation4], 0  ;;  %s358_s0 = inlined_call_operand.vmem [shape: f32[16,32], index: 0, kind: input, shape index: {}]   ;;  %s359_s1 = inlined_call_operand.vmem [shape: f32[1,32], index: 1, kind: input, shape index: {}]   ;;  %s360_s2 = inlined_call_operand.vmem [shape: f32[1,32], index: 2, kind: input, shape index: {}]   ;;  %s361_s3 = inlined_call_operand.hbm [shape: bf16[32,32], index: 3, kind: input, shape index: {}]   ;;  %s362_s4 = inlined_call_operand.hbm [shape: f32[1,32], index: 4, kind: input, shape index: {}]   ;;  %s363_s5 = inlined_call_operand.vmem [shape: f32[16,32], index: 5, kind: output, shape index: {}]  }
   0x1   :  { %11 = vsyncpa [#allocation6], 0  ;;  %s291_s18 = smov [#allocation3]  }
   0x2   :  { %s23_s19 = sshll.u32 %s291_s18, 4  ;;  %s24_s19 = int_to_ptr.vmem [resolvable:$true] %s23_s19 }
   0x3   :  { %s255_s20 = scalar_lea.vmem %s24_s19, 256  ;;  %p260_p1 = scmp.lt.s32.totalorder %s24_s19, %s24_s19 }
   0x4   :  { %p256_p0 = scmp.ne.s32.totalorder %s24_s19, %s255_s20  ;;  %p261_p2 = scmp.lt.s32.totalorder %s255_s20, %s255_s20 }
   0x6   :  { %p262_p3 = por %p261_p2, %p260_p1 }
   0x8   :  { %p263_p4 = pnand %p262_p3, %p256_p0 }
   0xa   :  { %266 = shalt.err (!%p263_p4)
}
   0xb   :  { %s292_s21 = smov 64   ;;  %s293_s22 = smov 4  }
   0xc   :  { %29 = dma.hbm_to_vmem [thread:$0]  %s361_s3, 256, %s24_s19, [#allocation4], %s292_s21, %s292_s21, %s293_s22  }
   0xd   :  { %s294_s25 = smov [#allocation5]  }
   0xe   :  { %s36_s26 = sshll.u32 %s294_s25, 4  ;;  %s37_s26 = int_to_ptr.vmem [resolvable:$true] %s36_s26 }
   0xf   :  { %s275_s27 = scalar_lea.vmem %s37_s26, 16  ;;  %s279_s28 = scalar_lea.vmem %s37_s26, 32 }
  0x10   :  { %p276_p5 = scmp.ne.s32.totalorder %s37_s26, %s275_s27  ;;  %p280_p6 = scmp.lt.s32.totalorder %s37_s26, %s37_s26 }
  0x11   :  { %p281_p7 = scmp.lt.s32.totalorder %s279_s28, %s275_s27 }
  0x13   :  { %p282_p8 = por %p281_p7, %p280_p6 }
  0x15   :  { %p283_p9 = pnand %p282_p8, %p276_p5 }
  0x17   :  { %286 = shalt.err (!%p283_p9)
}
  0x18   :  { %39 = dma.hbm_to_vmem [thread:$0]  %s362_s4, 16, %s37_s26, [#allocation6]  }
  0x19   :  { %287 = dma.done.wait [#allocation4], 256  }
  0x1a   :  { %288 = vsyncadd [#allocation4], 4294967040 }
  0x1b   :  { %289 = dma.done.wait [#allocation6], 16  }
  0x1c   :  { %290 = vsyncadd [#allocation6], 4294967280  ;;  %vm53_vm0 = vcmask 261120   ;;  %v51_v0 = vld [vmem:[%s358_s0] sm:$0xff]  ;;  %v52_v1 = vld [vmem:[%s358_s0 + $0x8] sm:$0xff]  ;;  %v295_v15 = vmov 0.0  }
  0x1d   :  { %v54_v2 = vsel %vm53_vm0, %v51_v0, 0.0  ;;  %v57_v3 = vsel %vm53_vm0, %v52_v1, 0.0  ;;  %v236_v14 = vld [vmem:[#allocation3 + $0x8] sm:$0xff]   ;;  %222 = vmatprep.subr.bf16.mxu0 %v295_v15  ;;  %vm296_vm1 = vmmov 0   ;;  %v237_v16 = vld [vmem:[#allocation3] sm:$0xff]   ;;  %vm122_vm6 = vcmask 257024  }
  0x1e   :  { %55 = vadd.xlane.f32.xlu0 %v54_v2  ;;  %226 = vmatprep.mubr.msk.bf16.mxu0 %vm296_vm1, %v295_v15  ;;  %v208_v33 = vld [vmem:[%s359_s1] ss:$0 sm:$0xff]  ;;  %v212_v46 = vld [vmem:[#allocation5] ss:$0 sm:$0xff] }
  0x1f   :  { %223 = vmatpush3.bf16.msra.mxu0 %v236_v14  ;;  %v209_v36 = vld [vmem:[%s360_s2] ss:$0 sm:$0xff] }
  0x20   :  { %224 = vmatprep.subr.bf16.mxu0 %v295_v15 }
  0x22   :  { %58 = vadd.xlane.f32.xlu0 %v57_v3 }
  0x23   :  { %225 = vmatpush3.bf16.msra.mxu0 %v237_v16 }
  0xa7   :  { %v56_v4 = vpop.xlane.xlu0 %55 }
  0xa8   :  { %v61_v5 = vmul.f32 0.03125, %v56_v4 }
  0xaa   :  { %v63_v6 = vsub.f32 %v51_v0, %v61_v5 }
  0xab   :  { %v59_v7 = vpop.xlane.xlu0 %58 }
  0xac   :  { %v62_v8 = vmul.f32 0.03125, %v59_v7  ;;  %v65_v9 = vmul.f32 %v63_v6, %v63_v6  ;;  %v101_v34 = vmul.f32 %v208_v33, %v63_v6 }
  0xae   :  { %v64_v10 = vsub.f32 %v52_v1, %v62_v8  ;;  %v67_v11 = vsel %vm53_vm0, %v65_v9, 0.0 }
  0xaf   :  { %68 = vadd.xlane.f32.xlu1 %v67_v11 }
  0xb0   :  { %v66_v12 = vmul.f32 %v64_v10, %v64_v10  ;;  %v102_v38 = vmul.f32 %v208_v33, %v64_v10 }
  0xb2   :  { %v70_v13 = vsel %vm53_vm0, %v66_v12, 0.0 }
  0xb3   :  { %71 = vadd.xlane.f32.xlu1 %v70_v13 }
 0x138   :  { %v69_v17 = vpop.xlane.xlu1 %68 }
 0x139   :  { %v74_v18 = vmul.f32 0.032258064, %v69_v17 }
 0x13b   :  { %239 = vrsqrt.f32 %v74_v18  ;;  %vm78_vm2 = vcmp.eq.f32.partialorder %v74_v18, inf  ;;  %v81_v23 = vand.u32 2147483648, %v74_v18  ;;  %vm80_vm3 = vcmp.eq.f32.partialorder %v74_v18, 0.0 }
 0x13c   :  { %v72_v19 = vpop.xlane.xlu1 %71 }
 0x13d   :  { %v75_v20 = vmul.f32 0.032258064, %v72_v19 }
 0x13f   :  { %241 = vrsqrt.f32 %v75_v20  ;;  %vm85_vm4 = vcmp.eq.f32.partialorder %v75_v20, inf  ;;  %v88_v29 = vand.u32 2147483648, %v75_v20  ;;  %vm87_vm5 = vcmp.eq.f32.partialorder %v75_v20, 0.0 }
 0x148   :  { %v240_v21 = vpop.eup %239 }
 0x149   :  { %v77_v22 = vmul.f32 %v240_v21, %v74_v18 }
 0x14b   :  { %v79_v24 = vsel %vm78_vm2, %v74_v18, %v77_v22 }
 0x14c   :  { %v242_v25 = vpop.eup %241  ;;  %v82_v26 = vsel %vm80_vm3, %v81_v23, %v79_v24 }
 0x14d   :  { %v90_v27 = vadd.f32 1e-06, %v82_v26  ;;  %v84_v28 = vmul.f32 %v242_v25, %v75_v20 }
 0x14f   :  { %243 = vrcp.f32 %v90_v27  ;;  %v86_v30 = vsel %vm85_vm4, %v75_v20, %v84_v28 }
 0x150   :  { %v89_v31 = vsel %vm87_vm5, %v88_v29, %v86_v30 }
 0x151   :  { %v91_v32 = vadd.f32 1e-06, %v89_v31 }
 0x153   :  { %245 = vrcp.f32 %v91_v32 }
 0x15c   :  { %v244_v35 = vpop.eup %243 }
 0x15d   :  { %v103_v37 = vmul.f32 %v244_v35, %v101_v34 }
 0x15f   :  { %v112_v39 = vadd.f32 %v209_v36, %v103_v37 }
 0x160   :  { %v246_v40 = vpop.eup %245 }
 0x161   :  { %v217_v41 = vpack.c.bf16 %v112_v39, %v112_v39  ;;  %v104_v42 = vmul.f32 %v246_v40, %v102_v38 }
 0x163   :  { %v113_v43 = vadd.f32 %v209_v36, %v104_v42  ;;  %123 = vst.msk [vmem:[#allocation2] sm:$0xf] %vm122_vm6, %v217_v41 }
 0x165   :  { %v218_v44 = vpack.c.bf16 %v113_v43, %v113_v43 }
 0x167   :  { %124 = vst.msk [vmem:[#allocation2 + $0x4] sm:$0xf] %vm122_vm6, %v218_v44 }
 0x16e   :  { %v238_v45 = vld [vmem:[#allocation2] sm:$0xff]  }
 0x16f   :  { %227 = vmatmul.mubr.msk.bf16.vlgmr.msra.gmra.mxu0 %vm53_vm0, %v238_v45 }
 0x22f   :  { %v193_v47 = vpop.f32.mrf.mxu0 }
 0x230   :  { %v194_v48 = vadd.f32 %v212_v46, %v193_v47 }
 0x231   :  { %v228_v49 = vpop.f32.mrf.mxu0 }
 0x232   :  { %200 = vst.msk [vmem:[%s363_s5] sm:$0xff] %vm53_vm0, %v194_v48 }
 0x233   :  { %v196_v50 = vpop.f32.mrf.mxu0 }
 0x234   :  { %v197_v51 = vadd.f32 %v212_v46, %v196_v50 }
 0x235   :  { %v229_v52 = vpop.f32.mrf.mxu0 }
 0x236   :  { %201 = vst.msk [vmem:[%s363_s5 + $0x8] sm:$0xff] %vm53_vm0, %v197_v51 }
 0x237   :  { %206 = vsyncpa [#allocation4], 1 }
 0x238   :  { %207 = vsyncpa [#allocation6], 1 }

// kernel: decoder_layer_forward.10
= control target key start
LH: loop header
LB: loop body
LE: loop exit
PB: predicated region body
PF: predicated region fallthrough
CT: control target
= control target key end

     0   :  { %10 = vsyncpa [#allocation4], 0  ;;  %s357_s0 = inlined_call_operand.vmem [shape: f32[16,32], index: 0, kind: input, shape index: {}]   ;;  %s358_s1 = inlined_call_operand.vmem [shape: f32[1,32], index: 1, kind: input, shape index: {}]   ;;  %s359_s2 = inlined_call_operand.vmem [shape: f32[1,32], index: 2, kind: input, shape index: {}]   ;;  %s360_s3 = inlined_call_operand.hbm [shape: bf16[32,64], index: 3, kind: input, shape index: {}]   ;;  %s361_s4 = inlined_call_operand.hbm [shape: f32[1,64], index: 4, kind: input, shape index: {}]   ;;  %s362_s5 = inlined_call_operand.vmem [shape: f32[16,64], index: 5, kind: output, shape index: {}]  }
   0x1   :  { %11 = vsyncpa [#allocation6], 0  ;;  %s292_s18 = smov [#allocation3]  }
   0x2   :  { %s23_s19 = sshll.u32 %s292_s18, 4  ;;  %s24_s19 = int_to_ptr.vmem [resolvable:$true] %s23_s19 }
   0x3   :  { %s256_s20 = scalar_lea.vmem %s24_s19, 256  ;;  %p261_p1 = scmp.lt.s32.totalorder %s24_s19, %s24_s19 }
   0x4   :  { %p257_p0 = scmp.ne.s32.totalorder %s24_s19, %s256_s20  ;;  %p262_p2 = scmp.lt.s32.totalorder %s256_s20, %s256_s20 }
   0x6   :  { %p263_p3 = por %p262_p2, %p261_p1 }
   0x8   :  { %p264_p4 = pnand %p263_p3, %p257_p0 }
   0xa   :  { %267 = shalt.err (!%p264_p4)
}
   0xb   :  { %s293_s21 = smov 64   ;;  %s294_s22 = smov 4  }
   0xc   :  { %29 = dma.hbm_to_vmem [thread:$0]  %s360_s3, 256, %s24_s19, [#allocation4], %s293_s21, %s293_s21, %s294_s22  }
   0xd   :  { %s295_s25 = smov [#allocation5]  }
   0xe   :  { %s36_s26 = sshll.u32 %s295_s25, 4  ;;  %s37_s26 = int_to_ptr.vmem [resolvable:$true] %s36_s26 }
   0xf   :  { %s276_s27 = scalar_lea.vmem %s37_s26, 16  ;;  %s280_s28 = scalar_lea.vmem %s37_s26, 32 }
  0x10   :  { %p277_p5 = scmp.ne.s32.totalorder %s37_s26, %s276_s27  ;;  %p281_p6 = scmp.lt.s32.totalorder %s37_s26, %s37_s26 }
  0x11   :  { %p282_p7 = scmp.lt.s32.totalorder %s280_s28, %s276_s27 }
  0x13   :  { %p283_p8 = por %p282_p7, %p281_p6 }
  0x15   :  { %p284_p9 = pnand %p283_p8, %p277_p5 }
  0x17   :  { %287 = shalt.err (!%p284_p9)
}
  0x18   :  { %39 = dma.hbm_to_vmem [thread:$0]  %s361_s4, 16, %s37_s26, [#allocation6]  }
  0x19   :  { %288 = dma.done.wait [#allocation4], 256  }
  0x1a   :  { %289 = vsyncadd [#allocation4], 4294967040 }
  0x1b   :  { %290 = dma.done.wait [#allocation6], 16  }
  0x1c   :  { %291 = vsyncadd [#allocation6], 4294967280  ;;  %vm53_vm0 = vcmask 261120   ;;  %v51_v0 = vld [vmem:[%s357_s0] sm:$0xff]  ;;  %v52_v1 = vld [vmem:[%s357_s0 + $0x8] sm:$0xff]  ;;  %v296_v15 = vmov 0.0  }
  0x1d   :  { %v54_v2 = vsel %vm53_vm0, %v51_v0, 0.0  ;;  %v57_v3 = vsel %vm53_vm0, %v52_v1, 0.0  ;;  %v237_v14 = vld [vmem:[#allocation3 + $0x8] sm:$0xff]   ;;  %223 = vmatprep.subr.bf16.mxu0 %v296_v15  ;;  %vm297_vm1 = vmmov 0   ;;  %v238_v16 = vld [vmem:[#allocation3] sm:$0xff]   ;;  %vm122_vm6 = vcmask 257024  }
  0x1e   :  { %55 = vadd.xlane.f32.xlu0 %v54_v2  ;;  %227 = vmatprep.mubr.msk.bf16.mxu0 %vm297_vm1, %v296_v15  ;;  %v209_v33 = vld [vmem:[%s358_s1] ss:$0 sm:$0xff]  ;;  %v213_v46 = vld [vmem:[#allocation5] ss:$0 sm:$0xff]  ;;  %vm200_vm7 = vcmask 523264  }
  0x1f   :  { %224 = vmatpush3.bf16.msra.mxu0 %v237_v14  ;;  %v210_v36 = vld [vmem:[%s359_s2] ss:$0 sm:$0xff] }
  0x20   :  { %225 = vmatprep.subr.bf16.mxu0 %v296_v15 }
  0x22   :  { %58 = vadd.xlane.f32.xlu0 %v57_v3 }
  0x23   :  { %226 = vmatpush3.bf16.msra.mxu0 %v238_v16 }
  0xa7   :  { %v56_v4 = vpop.xlane.xlu0 %55 }
  0xa8   :  { %v61_v5 = vmul.f32 0.03125, %v56_v4 }
  0xaa   :  { %v63_v6 = vsub.f32 %v51_v0, %v61_v5 }
  0xab   :  { %v59_v7 = vpop.xlane.xlu0 %58 }
  0xac   :  { %v62_v8 = vmul.f32 0.03125, %v59_v7  ;;  %v65_v9 = vmul.f32 %v63_v6, %v63_v6  ;;  %v101_v34 = vmul.f32 %v209_v33, %v63_v6 }
  0xae   :  { %v64_v10 = vsub.f32 %v52_v1, %v62_v8  ;;  %v67_v11 = vsel %vm53_vm0, %v65_v9, 0.0 }
  0xaf   :  { %68 = vadd.xlane.f32.xlu1 %v67_v11 }
  0xb0   :  { %v66_v12 = vmul.f32 %v64_v10, %v64_v10  ;;  %v102_v38 = vmul.f32 %v209_v33, %v64_v10 }
  0xb2   :  { %v70_v13 = vsel %vm53_vm0, %v66_v12, 0.0 }
  0xb3   :  { %71 = vadd.xlane.f32.xlu1 %v70_v13 }
 0x138   :  { %v69_v17 = vpop.xlane.xlu1 %68 }
 0x139   :  { %v74_v18 = vmul.f32 0.032258064, %v69_v17 }
 0x13b   :  { %240 = vrsqrt.f32 %v74_v18  ;;  %vm78_vm2 = vcmp.eq.f32.partialorder %v74_v18, inf  ;;  %v81_v23 = vand.u32 2147483648, %v74_v18  ;;  %vm80_vm3 = vcmp.eq.f32.partialorder %v74_v18, 0.0 }
 0x13c   :  { %v72_v19 = vpop.xlane.xlu1 %71 }
 0x13d   :  { %v75_v20 = vmul.f32 0.032258064, %v72_v19 }
 0x13f   :  { %242 = vrsqrt.f32 %v75_v20  ;;  %vm85_vm4 = vcmp.eq.f32.partialorder %v75_v20, inf  ;;  %v88_v29 = vand.u32 2147483648, %v75_v20  ;;  %vm87_vm5 = vcmp.eq.f32.partialorder %v75_v20, 0.0 }
 0x148   :  { %v241_v21 = vpop.eup %240 }
 0x149   :  { %v77_v22 = vmul.f32 %v241_v21, %v74_v18 }
 0x14b   :  { %v79_v24 = vsel %vm78_vm2, %v74_v18, %v77_v22 }
 0x14c   :  { %v243_v25 = vpop.eup %242  ;;  %v82_v26 = vsel %vm80_vm3, %v81_v23, %v79_v24 }
 0x14d   :  { %v90_v27 = vadd.f32 1e-06, %v82_v26  ;;  %v84_v28 = vmul.f32 %v243_v25, %v75_v20 }
 0x14f   :  { %244 = vrcp.f32 %v90_v27  ;;  %v86_v30 = vsel %vm85_vm4, %v75_v20, %v84_v28 }
 0x150   :  { %v89_v31 = vsel %vm87_vm5, %v88_v29, %v86_v30 }
 0x151   :  { %v91_v32 = vadd.f32 1e-06, %v89_v31 }
 0x153   :  { %246 = vrcp.f32 %v91_v32 }
 0x15c   :  { %v245_v35 = vpop.eup %244 }
 0x15d   :  { %v103_v37 = vmul.f32 %v245_v35, %v101_v34 }
 0x15f   :  { %v112_v39 = vadd.f32 %v210_v36, %v103_v37 }
 0x160   :  { %v247_v40 = vpop.eup %246 }
 0x161   :  { %v218_v41 = vpack.c.bf16 %v112_v39, %v112_v39  ;;  %v104_v42 = vmul.f32 %v247_v40, %v102_v38 }
 0x163   :  { %v113_v43 = vadd.f32 %v210_v36, %v104_v42  ;;  %123 = vst.msk [vmem:[#allocation2] sm:$0xf] %vm122_vm6, %v218_v41 }
 0x165   :  { %v219_v44 = vpack.c.bf16 %v113_v43, %v113_v43 }
 0x167   :  { %124 = vst.msk [vmem:[#allocation2 + $0x4] sm:$0xf] %vm122_vm6, %v219_v44 }
 0x16e   :  { %v239_v45 = vld [vmem:[#allocation2] sm:$0xff]  }
 0x16f   :  { %228 = vmatmul.mubr.msk.bf16.vlgmr.msra.gmra.mxu0 %vm53_vm0, %v239_v45 }
 0x22f   :  { %v193_v47 = vpop.f32.mrf.mxu0 }
 0x230   :  { %v194_v48 = vadd.f32 %v213_v46, %v193_v47 }
 0x231   :  { %v229_v49 = vpop.f32.mrf.mxu0 }
 0x232   :  { %201 = vst.msk [vmem:[%s362_s5] sm:$0xff] %vm200_vm7, %v194_v48 }
 0x233   :  { %v196_v50 = vpop.f32.mrf.mxu0 }
 0x234   :  { %v197_v51 = vadd.f32 %v213_v46, %v196_v50 }
 0x235   :  { %v230_v52 = vpop.f32.mrf.mxu0 }
 0x236   :  { %202 = vst.msk [vmem:[%s362_s5 + $0x8] sm:$0xff] %vm200_vm7, %v197_v51 }
 0x237   :  { %207 = vsyncpa [#allocation4], 1 }
 0x238   :  { %208 = vsyncpa [#allocation6], 1 }

// kernel: decoder_layer_forward.11
= control target key start
LH: loop header
LB: loop body
LE: loop exit
PB: predicated region body
PF: predicated region fallthrough
CT: control target
= control target key end

     0   :  { %s1002_s12 = smov 0   ;;  %s1004_s13 = smov 0   ;;  %s1116_s0 = inlined_call_operand.vmem [shape: f32[2,8,32], index: 0, kind: input, shape index: {}]   ;;  %s1117_s1 = inlined_call_operand.vmem [shape: f32[2,8,64], index: 1, kind: input, shape index: {}]   ;;  %s1118_s2 = inlined_call_operand.vmem [shape: s32[2,1,8,8], index: 2, kind: input, shape index: {}]   ;;  %s1119_s3 = inlined_call_operand.vmem [shape: f32[2,8,32], index: 3, kind: output, shape index: {}]  }
   0x1   :  { %s1006_s14 = smov 0  }
   0x2 LB: > { %s25_s15 = sadd.s32 1, %s964_s13  ;;  %p815_p0 = scmp.ge.s32.totalorder %s968_s14, 1  ;;  %s968_s14 = sphi %s1006_s14, %s13_s14   ;;  %s964_s13 = sphi %s1004_s13, %s1121_s13   ;;  %s960_s12 = sphi %s1002_s12, %s1120_s12  }
   0x3   : > { %p27_p1 = scmp.ge.s32.totalorder %s25_s15, 2  ;;  %p178_p2 = scmp.lt.s32.totalorder %s968_s14, 3 }
   0x5   : > { %s1123_s15 = smov (%p27_p1, %s25_s15), 0  ;;  %p179_p3 = pnand %p815_p0, %p178_p2 }
   0x6   : > { %p217_p4 = scmp.lt.s32.totalorder (!%p179_p3), %s960_s12, 1  ;;  %s972_s26 = smov (!%p179_p3), 96  }
   0x7   : > { %182 = sbr.rel (%p179_p3) target bundleno = 1378 (0x562), region = 32  ;;  %s973_s27 = smov (!%p179_p3), 120  }
   0x8   : > { %s974_s28 = smov (!%p179_p3), 112   ;;  %s975_s29 = smov (!%p179_p3), 104  }
   0x9   : > { %s976_s30 = smov (!%p179_p3), 88   ;;  %s977_s4 = smov (!%p179_p3), 72  }
   0xa   : > { %s978_s5 = smov (!%p179_p3), 80   ;;  %s979_s6 = smov (!%p179_p3), 8  }
   0xb   : > { %s980_s7 = smov (!%p179_p3), 16   ;;  %s981_s8 = smov (!%p179_p3), 24  }
   0xc   : > { %v970_v0 = vmov 0.0   ;;  %vm971_vm0 = vmmov 0   ;;  %s1125_s12 = smov (!%p217_p4, %s960_s12), 1  ;;  %vm251_vm1 = vcmask 64512   ;;  %vm316_vm3 = vcmask 1043456  }
   0xd   : > { %846 = vmatprep.subr.bf16.mxu0 %v970_v0  ;;  %848 = vmatprep.mubr.msk.bf16.mxu0 %vm971_vm0, %v970_v0  ;;  %s1026_s16 = sshll.u32 %s1125_s12, 3  ;;  %vm704_vm4 = vcmask 130048   ;;  %vm706_vm5 = vcmask 195584   ;;  %vm708_vm6 = vcmask 261120  }
   0xe   : > { %852 = vmatprep.subr.bf16.mxu1 %v970_v0  ;;  %854 = vmatprep.mubr.msk.bf16.mxu1 %vm971_vm0, %v970_v0  ;;  %s227_s19 = scalar_lea.vmem %s1117_s1, %s1026_s16  ;;  %s223_s22 = scalar_lea.vmem %s1116_s0, %s1026_s16 }
   0xf   : > { %v248_v1 = vld [vmem:[%s227_s19] sm:$0xff]  ;;  %s234_s25 = scalar_lea.vmem %s1118_s2, %s1026_s16  ;;  %s241_s11 = scalar_lea.vmem %s1119_s3, %s1026_s16 }
  0x10   : > { %v246_v2 = vld [vmem:[%s223_s22] sm:$0xff]  ;;  %v1036_v3 = vpack.c.bf16 %v248_v1, %v248_v1 }
  0x11   : > { %v247_v5 = vmul.f32 0.35355338, %v246_v2  ;;  %v243_v7 = vld [vmem:[%s234_s25] sm:$0xff] }
  0x12   : > { %v256_v4 = vsel %vm251_vm1, %v1036_v3, 0  ;;  %vm244_vm2 = vcmp.eq.s32.totalorder %v243_v7, 1  ;;  %311 = vrot.lane.b32.xlu1 %v1036_v3, %s972_s26 }
  0x13   : > { %847 = vmatpush3.bf16.xpose.msra.mxu0 %v256_v4  ;;  %v249_v6 = vpack.c.bf16 %v247_v5, %v247_v5  ;;  %v1049_v8 = vsel %vm244_vm2, -1e+09, %v970_v0 }
  0x14   : > { %864 = vmatprep.subr.bf16.mxu0 %v970_v0 }
  0x16   : > { %363 = vrot.lane.b32.xlu1 %v1036_v3, %s973_s27 }
  0x1a   : > { %849 = vmatmul.mubr.msk.bf16.vlgmr.msra.gmra.mxu0 %vm251_vm1, %v249_v6  ;;  %473 = vrot.lane.b32.xlu1 %v1036_v3, %s974_s28 }
  0x1b   : > { %866 = vmatprep.mubr.msk.bf16.mxu0 %vm971_vm0, %v970_v0 }
  0x1e   : > { %471 = vrot.lane.b32.xlu1 %v249_v6, %s974_s28 }
  0x22   : > { %583 = vrot.lane.b32.xlu1 %v1036_v3, %s975_s29 }
  0x26   : > { %581 = vrot.lane.b32.xlu1 %v249_v6, %s975_s29 }
  0x84   : > { %v312_v20 = vpop.permute.xlu1 %311 }
  0x85   : > { %v318_v21 = vsel %vm316_vm3, %v312_v20, 0 }
  0x86   : > { %853 = vmatpush3.bf16.msra.mxu1 %v318_v21 }
  0x87   : > { %858 = vmatprep.subr.bf16.mxu1 %v970_v0 }
  0x88   : > { %v364_v24 = vpop.permute.xlu1 %363 }
  0x89   : > { %v369_v26 = vsel %vm251_vm1, %v364_v24, 0 }
  0x8c   : > { %v474_v28 = vpop.permute.xlu1 %473 }
  0x8d   : > { %v479_v31 = vsel %vm251_vm1, %v474_v28, 0 }
  0x90   : > { %v472_v30 = vpop.permute.xlu1 %471 }
  0x94   : > { %v584_v32 = vpop.permute.xlu1 %583 }
  0x95   : > { %v589_v33 = vsel %vm251_vm1, %v584_v32, 0 }
  0x98   : > { %v582_v34 = vpop.permute.xlu1 %581 }
  0xda   : > { %v292_v9 = vpop.f32.mrf.mxu0 }
  0xdb   : > { %v293_v10 = vadd.f32 %v292_v9, %v1049_v8 }
  0xdc   : > { %v850_v11 = vpop.f32.mrf.mxu0 }
  0xdd   : > { %v298_v12 = vsel %vm251_vm1, %v293_v10, -inf }
  0xde   : > { %299 = vmax.xlane.f32.xlu0 %v298_v12  ;;  %v295_v13 = vpop.f32.mrf.mxu0 }
  0xe0   : > { %v851_v14 = vpop.f32.mrf.mxu0 }
 0x167   : > { %v300_v15 = vpop.xlane.xlu0 %299 }
 0x168   : > { %v301_v16 = vsub.f32 %v293_v10, %v300_v15 }
 0x16a   : > { %v302_v17 = vmul.f32 1.442695, %v301_v16 }
 0x16c   : > { %930 = vpow2.f32 %v302_v17 }
 0x179   : > { %v931_v18 = vpop.eup %930 }
 0x17a   : > { %v304_v19 = vsel %vm251_vm1, %v931_v18, 0.0 }
 0x17b   : > { %305 = vadd.xlane.f32.xlu0 %v304_v19 }
 0x191   : > { %361 = vrot.lane.b32.xlu0 %v249_v6, %s973_s27 }
 0x204   : > { %v306_v22 = vpop.xlane.xlu0 %305 }
 0x205   : > { %932 = vrcp.f32 %v306_v22 }
 0x208   : > { %v362_v29 = vpop.permute.xlu0 %361 }
 0x212   : > { %v933_v23 = vpop.eup %932 }
 0x213   : > { %v308_v25 = vmul.f32 %v933_v23, %v931_v18 }
 0x215   : > { %v309_v27 = vpack.c.bf16 %v308_v25, %v308_v25 }
 0x217   : > { %855 = vmatmul.mubr.msk.bf16.vlgmr.msra.gmra.mxu1 %vm251_vm1, %v309_v27 }
 0x218   : > { %859 = vmatpush3.bf16.xpose.msra.mxu1 %v369_v26  ;;  %860 = vmatprep.mubr.msk.bf16.mxu1 %vm971_vm0, %v970_v0 }
 0x219   : > { %870 = vmatprep.subr.bf16.mxu1 %v970_v0 }
 0x21f   : > { %861 = vmatmul.mubr.msk.bf16.vlgmr.msra.gmra.mxu1 %vm251_vm1, %v362_v29 }
 0x220   : > { %871 = vmatpush3.bf16.xpose.msra.mxu1 %v479_v31  ;;  %872 = vmatprep.mubr.msk.bf16.mxu1 %vm971_vm0, %v970_v0 }
 0x221   : > { %882 = vmatprep.subr.bf16.mxu1 %v970_v0 }
 0x227   : > { %873 = vmatmul.mubr.msk.bf16.vlgmr.msra.gmra.mxu1 %vm251_vm1, %v472_v30 }
 0x228   : > { %883 = vmatpush3.bf16.xpose.msra.mxu1 %v589_v33  ;;  %884 = vmatprep.mubr.msk.bf16.mxu1 %vm971_vm0, %v970_v0 }
 0x22f   : > { %885 = vmatmul.mubr.msk.bf16.vlgmr.msra.gmra.mxu1 %vm251_vm1, %v582_v34 }
 0x2d7   : > { %v1075_v35 = vpop.f32.mrf.mxu1 }
 0x2d9   : > { %v856_v36 = vpop.f32.mrf.mxu1 }
 0x2db   : > { %v357_v37 = vpop.f32.mrf.mxu1 }
 0x2dd   : > { %v857_v38 = vpop.f32.mrf.mxu1 }
 0x2df   : > { %v405_v39 = vpop.f32.mrf.mxu1 }
 0x2e0   : > { %v406_v40 = vadd.f32 %v405_v39, %v1049_v8 }
 0x2e1   : > { %v862_v41 = vpop.f32.mrf.mxu1 }
 0x2e2   : > { %v411_v42 = vsel %vm251_vm1, %v406_v40, -inf }
 0x2e3   : > { %412 = vmax.xlane.f32.xlu1 %v411_v42  ;;  %v408_v43 = vpop.f32.mrf.mxu1 }
 0x2e5   : > { %v863_v44 = vpop.f32.mrf.mxu1 }
 0x2e7   : > { %v515_v45 = vpop.f32.mrf.mxu1 }
 0x2e8   : > { %v516_v46 = vadd.f32 %v515_v45, %v1049_v8 }
 0x2e9   : > { %v874_v47 = vpop.f32.mrf.mxu1 }
 0x2ea   : > { %v521_v48 = vsel %vm251_vm1, %v516_v46, -inf }
 0x2eb   : > { %522 = vmax.xlane.f32.xlu0 %v521_v48  ;;  %v518_v49 = vpop.f32.mrf.mxu1 }
 0x2ed   : > { %v875_v50 = vpop.f32.mrf.mxu1 }
 0x2ef   : > { %v625_v51 = vpop.f32.mrf.mxu1 }
 0x2f0   : > { %v626_v52 = vadd.f32 %v625_v51, %v1049_v8 }
 0x2f1   : > { %v886_v53 = vpop.f32.mrf.mxu1 }
 0x2f2   : > { %v631_v54 = vsel %vm251_vm1, %v626_v52, -inf }
 0x2f3   : > { %632 = vmax.xlane.f32.xlu1 %v631_v54  ;;  %v628_v55 = vpop.f32.mrf.mxu1 }
 0x2f5   : > { %v887_v56 = vpop.f32.mrf.mxu1 }
 0x304   : > { %423 = vrot.lane.b32.xlu1 %v1036_v3, %s976_s30 }
 0x36c   : > { %v413_v57 = vpop.xlane.xlu1 %412 }
 0x36d   : > { %v414_v58 = vsub.f32 %v406_v40, %v413_v57 }
 0x36f   : > { %v415_v59 = vmul.f32 1.442695, %v414_v58 }
 0x371   : > { %934 = vpow2.f32 %v415_v59 }
 0x374   : > { %v523_v60 = vpop.xlane.xlu0 %522 }
 0x375   : > { %v524_v61 = vsub.f32 %v516_v46, %v523_v60 }
 0x377   : > { %v525_v62 = vmul.f32 1.442695, %v524_v61 }
 0x379   : > { %936 = vpow2.f32 %v525_v62 }
 0x37c   : > { %v633_v63 = vpop.xlane.xlu1 %632 }
 0x37d   : > { %v634_v1 = vsub.f32 %v626_v52, %v633_v63 }
 0x37e   : > { %v935_v2 = vpop.eup %934 }
 0x37f   : > { %v635_v4 = vmul.f32 1.442695, %v634_v1  ;;  %v417_v5 = vsel %vm251_vm1, %v935_v2, 0.0 }
 0x380   : > { %418 = vadd.xlane.f32.xlu0 %v417_v5  ;;  %v424_v6 = vpop.permute.xlu1 %423 }
 0x381   : > { %938 = vpow2.f32 %v635_v4  ;;  %v429_v7 = vsel %vm316_vm3, %v424_v6, 0 }
 0x382   : > { %865 = vmatpush3.bf16.msra.mxu0 %v429_v7 }
 0x383   : > { %876 = vmatprep.subr.bf16.mxu0 %v970_v0 }
 0x386   : > { %v937_v8 = vpop.eup %936 }
 0x387   : > { %v527_v9 = vsel %vm251_vm1, %v937_v8, 0.0 }
 0x388   : > { %528 = vadd.xlane.f32.xlu1 %v527_v9 }
 0x38e   : > { %v939_v10 = vpop.eup %938 }
 0x38f   : > { %v637_v11 = vsel %vm251_vm1, %v939_v10, 0.0 }
 0x390   : > { %638 = vadd.xlane.f32.xlu0 %v637_v11 }
 0x399   : > { %643 = vrot.lane.b32.xlu1 %v1036_v3, %s977_s4 }
 0x3a6   : > { %533 = vrot.lane.b32.xlu0 %v1036_v3, %s978_s5 }
 0x409   : > { %v419_v12 = vpop.xlane.xlu0 %418 }
 0x40a   : > { %940 = vrcp.f32 %v419_v12 }
 0x411   : > { %v529_v13 = vpop.xlane.xlu1 %528 }
 0x412   : > { %942 = vrcp.f32 %v529_v13 }
 0x415   : > { %v644_v3 = vpop.permute.xlu1 %643 }
 0x416   : > { %v649_v23 = vsel %vm316_vm3, %v644_v3, 0 }
 0x417   : > { %v941_v14 = vpop.eup %940 }
 0x418   : > { %v421_v15 = vmul.f32 %v941_v14, %v935_v2 }
 0x419   : > { %v639_v16 = vpop.xlane.xlu0 %638 }
 0x41a   : > { %944 = vrcp.f32 %v639_v16  ;;  %v422_v17 = vpack.c.bf16 %v421_v15, %v421_v15 }
 0x41c   : > { %867 = vmatmul.mubr.msk.bf16.vlgmr.msra.gmra.mxu0 %vm251_vm1, %v422_v17 }
 0x41d   : > { %v534_v18 = vpop.permute.xlu0 %533  ;;  %878 = vmatprep.mubr.msk.bf16.mxu0 %vm971_vm0, %v970_v0 }
 0x41e   : > { %v539_v19 = vsel %vm316_vm3, %v534_v18, 0 }
 0x41f   : > { %v943_v20 = vpop.eup %942  ;;  %877 = vmatpush3.bf16.msra.mxu0 %v539_v19 }
 0x420   : > { %v531_v21 = vmul.f32 %v943_v20, %v937_v8  ;;  %888 = vmatprep.subr.bf16.mxu0 %v970_v0 }
 0x422   : > { %v532_v22 = vpack.c.bf16 %v531_v21, %v531_v21 }
 0x424   : > { %879 = vmatmul.mubr.msk.bf16.vlgmr.msra.gmra.mxu0 %vm251_vm1, %v532_v22 }
 0x425   : > { %889 = vmatpush3.bf16.msra.mxu0 %v649_v23  ;;  %890 = vmatprep.mubr.msk.bf16.mxu0 %vm971_vm0, %v970_v0 }
 0x427   : > { %v945_v24 = vpop.eup %944 }
 0x428   : > { %v641_v25 = vmul.f32 %v945_v24, %v939_v10 }
 0x42a   : > { %v642_v26 = vpack.c.bf16 %v641_v25, %v641_v25 }
 0x42c   : > { %891 = vmatmul.mubr.msk.bf16.vlgmr.msra.gmra.mxu0 %vm251_vm1, %v642_v26 }
 0x4dc   : > { %v465_v27 = vpop.f32.mrf.mxu0 }
 0x4dd   : > { %692 = vrot.lane.b32.xlu1 %v465_v27, %s979_s6 }
 0x4de   : > { %v868_v28 = vpop.f32.mrf.mxu0 }
 0x4e0   : > { %v468_v29 = vpop.f32.mrf.mxu0 }
 0x4e2   : > { %v869_v30 = vpop.f32.mrf.mxu0 }
 0x4e4   : > { %v575_v31 = vpop.f32.mrf.mxu0 }
 0x4e5   : > { %696 = vrot.lane.b32.xlu0 %v575_v31, %s980_s7 }
 0x4e6   : > { %v880_v32 = vpop.f32.mrf.mxu0 }
 0x4e8   : > { %v578_v33 = vpop.f32.mrf.mxu0 }
 0x4ea   : > { %v881_v34 = vpop.f32.mrf.mxu0 }
 0x4ec   : > { %v685_v36 = vpop.f32.mrf.mxu0 }
 0x4ed   : > { %700 = vrot.lane.b32.xlu1 %v685_v36, %s981_s8 }
 0x4ee   : > { %v892_v0 = vpop.f32.mrf.mxu0 }
 0x4f0   : > { %v688_v37 = vpop.f32.mrf.mxu0 }
 0x4f2   : > { %v893_v38 = vpop.f32.mrf.mxu0 }
 0x54f   : > { %v693_v39 = vpop.permute.xlu1 %692 }
 0x550   : > { %v703_v41 = vsel %vm251_vm1, %v1075_v35, %v693_v39 }
 0x557   : > { %v697_v40 = vpop.permute.xlu0 %696 }
 0x558   : > { %v705_v42 = vsel %vm704_vm4, %v703_v41, %v697_v40 }
 0x55f   : > { %v701_v43 = vpop.permute.xlu1 %700 }
 0x560   : > { %v707_v44 = vsel %vm706_vm5, %v705_v42, %v701_v43 }
 0x561   : > { %709 = vst.msk [vmem:[%s241_s11] sm:$0xff] %vm708_vm6, %v707_v44 }
 0x562 PF: > { %s13_s14 = sadd.s32 1, %s968_s14   ;;  %s1120_s12 = smov %s964_s13 }
 0x563   : > { %p10_p5 = scmp.ge.s32.totalorder %s13_s14, 4   ;;  %s1121_s13 = smov %s1123_s15 }
 0x565   :  { %12 = sbr.rel (!%p10_p5) target bundleno = 2 (0x2), region = 68 }

// kernel: decoder_layer_forward.13
= control target key start
LH: loop header
LB: loop body
LE: loop exit
PB: predicated region body
PF: predicated region fallthrough
CT: control target
= control target key end

     0   :  { %vm19_vm0 = vcmask 261120   ;;  %v131_v0 = vmov 0.0   ;;  %vm132_vm1 = vmmov 0   ;;  %s205_s1 = inlined_call_operand.vmem [shape: bf16[32,32], index: 1, kind: input, shape index: {}]   ;;  %s206_s0 = inlined_call_operand.vmem [shape: f32[16,32], index: 0, kind: input, shape index: {}]   ;;  %s207_s3 = inlined_call_operand.vmem [shape: f32[16,32], index: 3, kind: output, shape index: {}]   ;;  %s208_s2 = inlined_call_operand.vmem [shape: f32[1,32], index: 2, kind: input, shape index: {}]  }
   0x1   :  { %119 = vmatprep.subr.bf16.mxu0 %v131_v0  ;;  %v129_v1 = vld [vmem:[%s205_s1 + $0x8] sm:$0xff]   ;;  %123 = vmatprep.mubr.msk.bf16.mxu0 %vm132_vm1, %v131_v0  ;;  %20 = vst.msk [vmem:[%s207_s3] sm:$0xff] %vm19_vm0, %v131_v0  ;;  %21 = vst.msk [vmem:[%s207_s3 + $0x8] sm:$0xff] %vm19_vm0, %v131_v0  ;;  %v130_v2 = vld [vmem:[%s205_s1] sm:$0xff]  }
   0x2   :  { %120 = vmatpush3.bf16.msra.mxu0 %v129_v1  ;;  %v24_v3 = vld [vmem:[%s206_s0] sm:$0xff]  ;;  %v25_v4 = vld [vmem:[%s206_s0 + $0x8] sm:$0xff] }
   0x3   :  { %121 = vmatprep.subr.bf16.mxu0 %v131_v0  ;;  %v26_v5 = vpack.c.bf16 %v25_v4, %v24_v3  ;;  %v115_v14 = vld [vmem:[%s208_s2] ss:$0 sm:$0xff] }
   0x6   :  { %122 = vmatpush3.bf16.msra.mxu0 %v130_v2 }
   0x8   :  { %v22_v6 = vld [vmem:[%s207_s3] sm:$0xff]  ;;  %v23_v10 = vld [vmem:[%s207_s3 + $0x8] sm:$0xff] }
   0x9   :  { %124 = vmatmul.mubr.msk.bf16.vlgmr.msra.gmra.mxu0 %vm19_vm0, %v26_v5 }
  0xc9   :  { %v81_v7 = vpop.f32.mrf.mxu0 }
  0xca   :  { %v88_v8 = vadd.f32 %v81_v7, %v22_v6 }
  0xcb   :  { %v125_v9 = vpop.f32.mrf.mxu0 }
  0xcc   :  { %90 = vst.msk [vmem:[%s207_s3] sm:$0xff] %vm19_vm0, %v88_v8 }
  0xcd   :  { %v84_v11 = vpop.f32.mrf.mxu0 }
  0xce   :  { %v89_v12 = vadd.f32 %v84_v11, %v23_v10 }
  0xcf   :  { %v126_v13 = vpop.f32.mrf.mxu0 }
  0xd0   :  { %91 = vst.msk [vmem:[%s207_s3 + $0x8] sm:$0xff] %vm19_vm0, %v89_v12 }
  0xd3   :  { %v95_v15 = vld [vmem:[%s207_s3] sm:$0xff] }
  0xd4   :  { %v104_v16 = vadd.f32 %v115_v14, %v95_v15 }
  0xd6   :  { %106 = vst.msk [vmem:[%s207_s3] sm:$0xff] %vm19_vm0, %v104_v16 }
  0xd7   :  { %v96_v17 = vld [vmem:[%s207_s3 + $0x8] sm:$0xff] }
  0xd8   :  { %v105_v18 = vadd.f32 %v115_v14, %v96_v17 }
  0xda   :  { %107 = vst.msk [vmem:[%s207_s3 + $0x8] sm:$0xff] %vm19_vm0, %v105_v18 }

// kernel: decoder_layer_forward.14
= control target key start
LH: loop header
LB: loop body
LE: loop exit
PB: predicated region body
PF: predicated region fallthrough
CT: control target
= control target key end

     0   :  { %10 = vsyncpa [#allocation4], 0  ;;  %s256_s18 = smov [#allocation3]   ;;  %s320_s0 = inlined_call_operand.vmem [shape: f32[16,32], index: 0, kind: input, shape index: {}]   ;;  %s321_s1 = inlined_call_operand.vmem [shape: f32[1,32], index: 1, kind: input, shape index: {}]   ;;  %s322_s2 = inlined_call_operand.vmem [shape: f32[1,32], index: 2, kind: input, shape index: {}]   ;;  %s323_s3 = inlined_call_operand.hbm [shape: bf16[32,64], index: 3, kind: input, shape index: {}]   ;;  %s324_s4 = inlined_call_operand.vmem [shape: f32[1,64], index: 4, kind: input, shape index: {}]   ;;  %s325_s5 = inlined_call_operand.vmem [shape: f32[16,64], index: 5, kind: output, shape index: {}]  }
   0x1   :  { %s22_s19 = sshll.u32 %s256_s18, 4  ;;  %s23_s19 = int_to_ptr.vmem [resolvable:$true] %s22_s19 }
   0x2   :  { %s242_s20 = scalar_lea.vmem %s23_s19, 256  ;;  %p247_p1 = scmp.lt.s32.totalorder %s23_s19, %s23_s19 }
   0x3   :  { %p243_p0 = scmp.ne.s32.totalorder %s23_s19, %s242_s20  ;;  %p248_p2 = scmp.lt.s32.totalorder %s242_s20, %s242_s20 }
   0x5   :  { %p249_p3 = por %p248_p2, %p247_p1 }
   0x7   :  { %p250_p4 = pnand %p249_p3, %p243_p0 }
   0x9   :  { %253 = shalt.err (!%p250_p4)
}
   0xa   :  { %s257_s21 = smov 64   ;;  %s258_s22 = smov 4  }
   0xb   :  { %28 = dma.hbm_to_vmem [thread:$0]  %s323_s3, 256, %s23_s19, [#allocation4], %s257_s21, %s257_s21, %s258_s22  }
   0xc   :  { %254 = dma.done.wait [#allocation4], 256  }
   0xd   :  { %255 = vsyncadd [#allocation4], 4294967040  ;;  %vm41_vm0 = vcmask 261120   ;;  %v39_v0 = vld [vmem:[%s320_s0] sm:$0xff]  ;;  %v40_v1 = vld [vmem:[%s320_s0 + $0x8] sm:$0xff]  ;;  %v259_v15 = vmov 0.0  }
   0xe   :  { %v42_v2 = vsel %vm41_vm0, %v39_v0, 0.0  ;;  %v45_v3 = vsel %vm41_vm0, %v40_v1, 0.0  ;;  %v223_v14 = vld [vmem:[#allocation3 + $0x8] sm:$0xff]   ;;  %210 = vmatprep.subr.bf16.mxu0 %v259_v15  ;;  %vm260_vm1 = vmmov 0   ;;  %v224_v16 = vld [vmem:[#allocation3] sm:$0xff]   ;;  %vm110_vm6 = vcmask 257024  }
   0xf   :  { %43 = vadd.xlane.f32.xlu0 %v42_v2  ;;  %214 = vmatprep.mubr.msk.bf16.mxu0 %vm260_vm1, %v259_v15  ;;  %v196_v33 = vld [vmem:[%s321_s1] ss:$0 sm:$0xff]  ;;  %vm188_vm7 = vcmask 523264  }
  0x10   :  { %211 = vmatpush3.bf16.msra.mxu0 %v223_v14  ;;  %v197_v36 = vld [vmem:[%s322_s2] ss:$0 sm:$0xff] }
  0x11   :  { %212 = vmatprep.subr.bf16.mxu0 %v259_v15  ;;  %v200_v46 = vld [vmem:[%s324_s4] ss:$0 sm:$0xff] }
  0x13   :  { %46 = vadd.xlane.f32.xlu0 %v45_v3 }
  0x14   :  { %213 = vmatpush3.bf16.msra.mxu0 %v224_v16 }
  0x98   :  { %v44_v4 = vpop.xlane.xlu0 %43 }
  0x99   :  { %v49_v5 = vmul.f32 0.03125, %v44_v4 }
  0x9b   :  { %v51_v6 = vsub.f32 %v39_v0, %v49_v5 }
  0x9c   :  { %v47_v7 = vpop.xlane.xlu0 %46 }
  0x9d   :  { %v50_v8 = vmul.f32 0.03125, %v47_v7  ;;  %v53_v9 = vmul.f32 %v51_v6, %v51_v6  ;;  %v89_v34 = vmul.f32 %v196_v33, %v51_v6 }
  0x9f   :  { %v52_v10 = vsub.f32 %v40_v1, %v50_v8  ;;  %v55_v11 = vsel %vm41_vm0, %v53_v9, 0.0 }
  0xa0   :  { %56 = vadd.xlane.f32.xlu1 %v55_v11 }
  0xa1   :  { %v54_v12 = vmul.f32 %v52_v10, %v52_v10  ;;  %v90_v38 = vmul.f32 %v196_v33, %v52_v10 }
  0xa3   :  { %v58_v13 = vsel %vm41_vm0, %v54_v12, 0.0 }
  0xa4   :  { %59 = vadd.xlane.f32.xlu1 %v58_v13 }
 0x129   :  { %v57_v17 = vpop.xlane.xlu1 %56 }
 0x12a   :  { %v62_v18 = vmul.f32 0.032258064, %v57_v17 }
 0x12c   :  { %226 = vrsqrt.f32 %v62_v18  ;;  %vm66_vm2 = vcmp.eq.f32.partialorder %v62_v18, inf  ;;  %v69_v23 = vand.u32 2147483648, %v62_v18  ;;  %vm68_vm3 = vcmp.eq.f32.partialorder %v62_v18, 0.0 }
 0x12d   :  { %v60_v19 = vpop.xlane.xlu1 %59 }
 0x12e   :  { %v63_v20 = vmul.f32 0.032258064, %v60_v19 }
 0x130   :  { %228 = vrsqrt.f32 %v63_v20  ;;  %vm73_vm4 = vcmp.eq.f32.partialorder %v63_v20, inf  ;;  %v76_v29 = vand.u32 2147483648, %v63_v20  ;;  %vm75_vm5 = vcmp.eq.f32.partialorder %v63_v20, 0.0 }
 0x139   :  { %v227_v21 = vpop.eup %226 }
 0x13a   :  { %v65_v22 = vmul.f32 %v227_v21, %v62_v18 }
 0x13c   :  { %v67_v24 = vsel %vm66_vm2, %v62_v18, %v65_v22 }
 0x13d   :  { %v229_v25 = vpop.eup %228  ;;  %v70_v26 = vsel %vm68_vm3, %v69_v23, %v67_v24 }
 0x13e   :  { %v78_v27 = vadd.f32 1e-06, %v70_v26  ;;  %v72_v28 = vmul.f32 %v229_v25, %v63_v20 }
 0x140   :  { %230 = vrcp.f32 %v78_v27  ;;  %v74_v30 = vsel %vm73_vm4, %v63_v20, %v72_v28 }
 0x141   :  { %v77_v31 = vsel %vm75_vm5, %v76_v29, %v74_v30 }
 0x142   :  { %v79_v32 = vadd.f32 1e-06, %v77_v31 }
 0x144   :  { %232 = vrcp.f32 %v79_v32 }
 0x14d   :  { %v231_v35 = vpop.eup %230 }
 0x14e   :  { %v91_v37 = vmul.f32 %v231_v35, %v89_v34 }
 0x150   :  { %v100_v39 = vadd.f32 %v197_v36, %v91_v37 }
 0x151   :  { %v233_v40 = vpop.eup %232 }
 0x152   :  { %v205_v41 = vpack.c.bf16 %v100_v39, %v100_v39  ;;  %v92_v42 = vmul.f32 %v233_v40, %v90_v38 }
 0x154   :  { %v101_v43 = vadd.f32 %v197_v36, %v92_v42  ;;  %111 = vst.msk [vmem:[#allocation2] sm:$0xf] %vm110_vm6, %v205_v41 }
 0x156   :  { %v206_v44 = vpack.c.bf16 %v101_v43, %v101_v43 }
 0x158   :  { %112 = vst.msk [vmem:[#allocation2 + $0x4] sm:$0xf] %vm110_vm6, %v206_v44 }
 0x15f   :  { %v225_v45 = vld [vmem:[#allocation2] sm:$0xff]  }
 0x160   :  { %215 = vmatmul.mubr.msk.bf16.vlgmr.msra.gmra.mxu0 %vm41_vm0, %v225_v45 }
 0x220   :  { %v181_v47 = vpop.f32.mrf.mxu0 }
 0x221   :  { %v182_v48 = vadd.f32 %v200_v46, %v181_v47 }
 0x222   :  { %v216_v49 = vpop.f32.mrf.mxu0 }
 0x223   :  { %189 = vst.msk [vmem:[%s325_s5] sm:$0xff] %vm188_vm7, %v182_v48 }
 0x224   :  { %v184_v50 = vpop.f32.mrf.mxu0 }
 0x225   :  { %v185_v51 = vadd.f32 %v200_v46, %v184_v50 }
 0x226   :  { %v217_v52 = vpop.f32.mrf.mxu0 }
 0x227   :  { %190 = vst.msk [vmem:[%s325_s5 + $0x8] sm:$0xff] %vm188_vm7, %v185_v51 }
 0x228   :  { %195 = vsyncpa [#allocation4], 1 }

// kernel: decoder_layer_forward.17
= control target key start
LH: loop header
LB: loop body
LE: loop exit
PB: predicated region body
PF: predicated region fallthrough
CT: control target
= control target key end

     0   :  { %13 = vsyncpa [#allocation5], 0  ;;  %s1510_s27 = smov 0   ;;  %s1512_s28 = smov 0   ;;  %s1684_s0 = inlined_call_operand.vmem [shape: f32[16,32], index: 0, kind: input, shape index: {}, may-alias: {0,7}]   ;;  %s1685_s1 = inlined_call_operand.vmem [shape: f32[1,32], index: 1, kind: input, shape index: {}]   ;;  %s1686_s2 = inlined_call_operand.vmem [shape: f32[1,32], index: 2, kind: input, shape index: {}]   ;;  %s1687_s3 = inlined_call_operand.vmem [shape: bf16[32,2048], index: 3, kind: input, shape index: {}]   ;;  %s1688_s4 = inlined_call_operand.vmem [shape: f32[1,2048], index: 4, kind: input, shape index: {}]   ;;  %s1689_s5 = inlined_call_operand.vmem [shape: bf16[2048,32], index: 5, kind: input, shape index: {}]   ;;  %s1690_s6 = inlined_call_operand.vmem [shape: f32[1,32], index: 6, kind: input, shape index: {}]   ;;  %s1691_s7 = inlined_call_operand.vmem [shape: f32[16,32], index: 7, kind: input, shape index: {}, may-alias: {0,7}]   ;;  %s1692_s8 = inlined_call_operand.hbm [shape: f32[16,32], index: 8, kind: output, shape index: {}]  }
   0x1   :  { %s1514_s29 = smov 0   ;;  %s1516_s30 = smov 0  }
   0x2   :  { %s1518_s9 = smov 0  }
   0x3 LB: > { %s1174_s10 = sadd.s32 4294967295, %s1458_s9   ;;  %s28_s11 = sadd.s32 1, %s1454_s30  ;;  %s1458_s9 = sphi %s1518_s9, %s19_s9   ;;  %s1454_s30 = sphi %s1516_s30, %s1697_s30   ;;  %s1450_s29 = sphi %s1514_s29, %s1696_s29   ;;  %s1446_s28 = sphi %s1512_s28, %s1695_s28   ;;  %s1442_s27 = sphi %s1510_s27, %s1694_s27  }
   0x4   : > { %p29_p0 = scmp.ge.s32.totalorder %s28_s11, 4  ;;  %p113_p1 = scmp.ne.s32.totalorder %s1446_s28, %s1442_s27 }
   0x5   : > { %p114_p2 = scmp.eq.s32.totalorder %s1458_s9, 0  ;;  %s106_s13 = sadd.s32 1, %s1446_s28 }
   0x6   : > { %s1699_s11 = smov (%p29_p0, %s28_s11), 0  ;;  %p1178_p5 = scmp.ge.s32.totalorder %s1458_s9, 4 }
   0x7   : > { %p115_p3 = por %p114_p2, %p113_p1  ;;  %s103_s12 = ssub.s32 %s1454_s30, %s1699_s11 }
   0x8   : > { %p104_p4 = scmp.eq.s32.totalorder %s103_s12, 0  ;;  %291 = sbr.rel (%p1178_p5) target bundleno = 21 (0x15), region = 36 }
   0xa   : > { %s1546_s14 = scalar_select %p104_p4, %s1446_s28, %s106_s13  }
   0xd   : > { %294 = sbr.rel (!%p115_p3) target bundleno = 21 (0x15), region = 40  ;;  %s296_s15 = sand.u32 (%p115_p3), 1, %s1446_s28  }
   0xe   : > { %s1241_s16 = sshll.u32 (%p115_p3), %s1454_s30, 4  ;;  %s1179_s17 = sshll.u32 (%p115_p3), %s296_s15, 6 }
   0xf   : > { %s301_s20 = scalar_lea.vmem (%p115_p3), %s1687_s3, %s1241_s16  ;;  %s298_s21 = scalar_lea.vmem (%p115_p3), [#allocation3], %s1179_s17 }
  0x10   : > { %v314_v0 = vld [vmem:[%s301_s20] sm:$0xff] (%p115_p3)  ;;  %v316_v1 = vld [vmem:[%s301_s20 + $0x8] sm:$0xff] (%p115_p3) }
  0x11   : > { %v318_v2 = vld [vmem:[%s301_s20 + $0x40] sm:$0xff] (%p115_p3)  ;;  %315 = vst [vmem:[%s298_s21] sm:$0xff] (%p115_p3), %v314_v0  ;;  %317 = vst [vmem:[%s298_s21 + $0x8] sm:$0xff] (%p115_p3), %v316_v1  ;;  %v320_v3 = vld [vmem:[%s301_s20 + $0x48] sm:$0xff] (%p115_p3) }
  0x12   : > { %319 = vst [vmem:[%s298_s21 + $0x10] sm:$0xff] %v318_v2  ;;  %v322_v4 = vld [vmem:[%s301_s20 + $0x80] sm:$0xff]  ;;  %v324_v5 = vld [vmem:[%s301_s20 + $0x88] sm:$0xff]  ;;  %321 = vst [vmem:[%s298_s21 + $0x18] sm:$0xff] %v320_v3 }
  0x13   : > { %323 = vst [vmem:[%s298_s21 + $0x20] sm:$0xff] %v322_v4  ;;  %325 = vst [vmem:[%s298_s21 + $0x28] sm:$0xff] %v324_v5  ;;  %v326_v6 = vld [vmem:[%s301_s20 + $0xc0] sm:$0xff]  ;;  %v328_v7 = vld [vmem:[%s301_s20 + $0xc8] sm:$0xff] }
  0x14   : > { %327 = vst [vmem:[%s298_s21 + $0x30] sm:$0xff] %v326_v6  ;;  %329 = vst [vmem:[%s298_s21 + $0x38] sm:$0xff] %v328_v7 }
  0x15 PF: > { %p1182_p6 = scmp.ge.s32.totalorder %s1458_s9, 1  ;;  %p351_p7 = scmp.lt.s32.totalorder %s1458_s9, 5 }
  0x17   : > { %p352_p8 = pnand %p1182_p6, %p351_p7 }
  0x18   : > { %s358_s22 = sand.u32 (!%p352_p8), 1, %s1442_s27   ;;  %s1184_s23 = sshll.u32 (!%p352_p8), %s1450_s29, 2 }
  0x19   : > { %355 = sbr.rel (%p352_p8) target bundleno = 819 (0x333), region = 71  ;;  %s1183_s24 = sshll.u32 (!%p352_p8), %s358_s22, 6 }
  0x1a   : > { %p413_p9 = scmp.lt.s32.totalorder (!%p352_p8), %s1184_s23, 15  ;;  %s1185_s25 = sshll.u32 (!%p352_p8), %s1450_s29, 6 }
  0x1b   : > { %p418_p10 = scmp.lt.s32.totalorder (!%p352_p8), %s1185_s25, 255  ;;  %s1570_s27 = scalar_lea.vmem (!%p352_p8), [#allocation3], %s1183_s24 }
  0x1c   : > { %p1187_p11 = scmp.ne.s32.totalorder (!%p352_p8), %s1450_s29, 0 }
  0x1e   : > { %s1701_s23 = smov (!%p413_p9, %s1184_s23), 15  ;;  %s1703_s25 = smov (!%p418_p10, %s1185_s25), 255 }
  0x1f   : > { %s415_s13 = scalar_lea.vmem %s1688_s4, %s1701_s23  ;;  %s1186_s15 = sshll.u32 %s1703_s25, 2 }
  0x20   : > { %s1568_s18 = scalar_lea.vmem %s1689_s5, %s1186_s15  ;;  %434 = sbr.rel (%p1187_p11) target bundleno = 369 (0x171), region = 79 }
  0x25   : > { %v435_v8 = vld [vmem:[%s1684_s0] sm:$0xff]  ;;  %vm437_vm0 = vcmask 261120   ;;  %v436_v9 = vld [vmem:[%s1684_s0 + $0x8] sm:$0xff]  ;;  %v1460_v11 = vmov 0.0   ;;  %vm506_vm5 = vcmask 257024  }
  0x26   : > { %v438_v10 = vsel %vm437_vm0, %v435_v8, 0.0  ;;  %509 = vst.msk [vmem:[#allocation4] sm:$0xff] %vm437_vm0, %v1460_v11  ;;  %510 = vst.msk [vmem:[#allocation4 + $0x8] sm:$0xff] %vm437_vm0, %v1460_v11  ;;  %v441_v12 = vsel %vm437_vm0, %v436_v9, 0.0  ;;  %v1188_v39 = vld [vmem:[%s1685_s1] ss:$0 sm:$0xff] }
  0x27   : > { %439 = vadd.xlane.f32.xlu0 %v438_v10  ;;  %v1189_v42 = vld [vmem:[%s1686_s2] ss:$0 sm:$0xff] }
  0x2b   : > { %442 = vadd.xlane.f32.xlu0 %v441_v12 }
  0xb0   : > { %v440_v13 = vpop.xlane.xlu0 %439 }
  0xb1   : > { %v445_v14 = vmul.f32 0.03125, %v440_v13 }
  0xb3   : > { %v447_v15 = vsub.f32 %v435_v8, %v445_v14 }
  0xb4   : > { %v443_v16 = vpop.xlane.xlu0 %442 }
  0xb5   : > { %v446_v17 = vmul.f32 0.03125, %v443_v16  ;;  %v449_v18 = vmul.f32 %v447_v15, %v447_v15  ;;  %v485_v40 = vmul.f32 %v1188_v39, %v447_v15 }
  0xb7   : > { %v448_v19 = vsub.f32 %v436_v9, %v446_v17  ;;  %v451_v20 = vsel %vm437_vm0, %v449_v18, 0.0 }
  0xb8   : > { %452 = vadd.xlane.f32.xlu1 %v451_v20 }
  0xb9   : > { %v450_v21 = vmul.f32 %v448_v19, %v448_v19  ;;  %v486_v44 = vmul.f32 %v1188_v39, %v448_v19 }
  0xbb   : > { %v454_v22 = vsel %vm437_vm0, %v450_v21, 0.0 }
  0xbc   : > { %455 = vadd.xlane.f32.xlu1 %v454_v22 }
 0x141   : > { %v453_v23 = vpop.xlane.xlu1 %452 }
 0x142   : > { %v458_v24 = vmul.f32 0.032258064, %v453_v23 }
 0x144   : > { %1339 = vrsqrt.f32 %v458_v24  ;;  %vm462_vm1 = vcmp.eq.f32.partialorder %v458_v24, inf  ;;  %v465_v29 = vand.u32 2147483648, %v458_v24  ;;  %vm464_vm2 = vcmp.eq.f32.partialorder %v458_v24, 0.0 }
 0x145   : > { %v456_v25 = vpop.xlane.xlu1 %455 }
 0x146   : > { %v459_v26 = vmul.f32 0.032258064, %v456_v25 }
 0x148   : > { %1341 = vrsqrt.f32 %v459_v26  ;;  %vm469_vm3 = vcmp.eq.f32.partialorder %v459_v26, inf  ;;  %v472_v35 = vand.u32 2147483648, %v459_v26  ;;  %vm471_vm4 = vcmp.eq.f32.partialorder %v459_v26, 0.0 }
 0x151   : > { %v1340_v27 = vpop.eup %1339 }
 0x152   : > { %v461_v28 = vmul.f32 %v1340_v27, %v458_v24 }
 0x154   : > { %v463_v30 = vsel %vm462_vm1, %v458_v24, %v461_v28 }
 0x155   : > { %v1342_v31 = vpop.eup %1341  ;;  %v466_v32 = vsel %vm464_vm2, %v465_v29, %v463_v30 }
 0x156   : > { %v474_v33 = vadd.f32 1e-06, %v466_v32  ;;  %v468_v34 = vmul.f32 %v1342_v31, %v459_v26 }
 0x158   : > { %1343 = vrcp.f32 %v474_v33  ;;  %v470_v36 = vsel %vm469_vm3, %v459_v26, %v468_v34 }
 0x159   : > { %v473_v37 = vsel %vm471_vm4, %v472_v35, %v470_v36 }
 0x15a   : > { %v475_v38 = vadd.f32 1e-06, %v473_v37 }
 0x15c   : > { %1345 = vrcp.f32 %v475_v38 }
 0x165   : > { %v1344_v41 = vpop.eup %1343 }
 0x166   : > { %v487_v43 = vmul.f32 %v1344_v41, %v485_v40 }
 0x168   : > { %v496_v45 = vadd.f32 %v1189_v42, %v487_v43 }
 0x169   : > { %v1346_v46 = vpop.eup %1345 }
 0x16a   : > { %v1242_v47 = vpack.c.bf16 %v496_v45, %v496_v45  ;;  %v488_v48 = vmul.f32 %v1346_v46, %v486_v44 }
 0x16c   : > { %507 = vst.msk [vmem:[#allocation2] sm:$0xf] %vm506_vm5, %v1242_v47  ;;  %v497_v49 = vadd.f32 %v1189_v42, %v488_v48 }
 0x16e   : > { %v1243_v50 = vpack.c.bf16 %v497_v49, %v497_v49 }
 0x170   : > { %508 = vst.msk [vmem:[#allocation2 + $0x4] sm:$0xf] %vm506_vm5, %v1243_v50 }
 0x171 PF: > { %v1347_v51 = vld [vmem:[%s1570_s27 + $0x24] ss:$16 sps:$4 sm:$0xff]   ;;  %v1349_v52 = vld [vmem:[%s1570_s27 + $0x2c] ss:$16 sps:$4 sm:$0xff]   ;;  %v1461_v53 = vmov 0   ;;  %vm588_vm6 = vcmask 261120   ;;  %v523_v29 = vlaneseq }
 0x172   : > { %624 = vmatprep.mubr.bf16.mxu0 %v1461_v53  ;;  %667 = vmatprep.mubr.bf16.mxu1 %v1461_v53  ;;  %v1351_v54 = vld [vmem:[%s1570_s27 + $0x20] ss:$16 sps:$4 sm:$0xff]   ;;  %v1352_v55 = vld [vmem:[%s1570_s27 + $0x28] ss:$16 sps:$4 sm:$0xff]   ;;  %v1353_v56 = vld [vmem:[%s1570_s27 + $0x4] ss:$16 sps:$4 sm:$0xff]  }
 0x173   : > { %604 = vmatprep.subr.bf16.mxu0 %v1347_v51  ;;  %647 = vmatprep.subr.bf16.mxu1 %v1349_v52  ;;  %v1355_v57 = vld [vmem:[%s1570_s27 + $0xc] ss:$16 sps:$4 sm:$0xff]   ;;  %v1357_v58 = vld [vmem:[%s1570_s27] ss:$16 sps:$4 sm:$0xff]   ;;  %v1358_v59 = vld [vmem:[%s1570_s27 + $0x8] ss:$16 sps:$4 sm:$0xff]  }
 0x174   : > { %605 = vmatpush1.bf16.msra.mxu0 %v1351_v54  ;;  %648 = vmatpush1.bf16.msra.mxu1 %v1352_v55  ;;  %v1360_v61 = vld [vmem:[%s1568_s18 + $0x78] sm:$0xff]   ;;  %v1364_v1 = vld [vmem:[%s1568_s18 + $0x70] sm:$0xff]   ;;  %v1368_v5 = vld [vmem:[%s1568_s18 + $0x68] sm:$0xff]   ;;  %v524_v30 = vshrl.u32 %v523_v29, 7  ;;  %p1235_p12 = scmp.ne.s32.totalorder %s1450_s29, 3 }
 0x175   : > { %606 = vmatprep.subr.bf16.mxu0 %v1353_v56  ;;  %649 = vmatprep.subr.bf16.mxu1 %v1355_v57  ;;  %v1361_v62 = vld [vmem:[%s1568_s18 + $0xf8] sm:$0xff]   ;;  %v1365_v2 = vld [vmem:[%s1568_s18 + $0xf0] sm:$0xff]   ;;  %v1369_v6 = vld [vmem:[%s1568_s18 + $0xe8] sm:$0xff]  }
 0x176   : > { %v1362_v63 = vld [vmem:[%s1568_s18 + $0x38] sm:$0xff]   ;;  %v1366_v3 = vld [vmem:[%s1568_s18 + $0x30] sm:$0xff]   ;;  %v1370_v7 = vld [vmem:[%s1568_s18 + $0x28] sm:$0xff]   ;;  %v529_v31 = vsub.s32 1, %v524_v30  ;;  %v537_v32 = vsub.s32 3, %v524_v30  ;;  %v525_v33 = vsub.s32 0, %v524_v30 }
 0x177   : > { %v1359_v60 = vld [vmem:[#allocation2] sm:$0xff]   ;;  %v1363_v0 = vld [vmem:[%s1568_s18 + $0xb8] sm:$0xff]   ;;  %v1367_v4 = vld [vmem:[%s1568_s18 + $0xb0] sm:$0xff]   ;;  %v533_v34 = vsub.s32 2, %v524_v30 }
 0x178   : > { %607 = vmatpush1.bf16.msra.mxu0 %v1357_v58  ;;  %650 = vmatpush1.bf16.msra.mxu1 %v1358_v59  ;;  %v1371_v8 = vld [vmem:[%s1568_s18 + $0xa8] sm:$0xff]   ;;  %v1372_v9 = vld [vmem:[%s1568_s18 + $0x60] sm:$0xff]   ;;  %v1376_v13 = vld [vmem:[%s1568_s18 + $0x58] sm:$0xff]  }
 0x179   : > { %1244 = vmatprep.subr.bf16.mxu0 %v1360_v61  ;;  %1266 = vmatprep.subr.bf16.mxu1 %v1361_v62  ;;  %v1373_v10 = vld [vmem:[%s1568_s18 + $0xe0] sm:$0xff]   ;;  %v1377_v14 = vld [vmem:[%s1568_s18 + $0xd8] sm:$0xff]   ;;  %v1380_v17 = vld [vmem:[%s1568_s18 + $0x50] sm:$0xff]  }
 0x17a   : > { %v1374_v11 = vld [vmem:[%s1568_s18 + $0x20] sm:$0xff]   ;;  %v1378_v15 = vld [vmem:[%s1568_s18 + $0x18] sm:$0xff]   ;;  %v1381_v18 = vld [vmem:[%s1568_s18 + $0xd0] sm:$0xff]  }
 0x17b   : > { %1201 = vmatmul.mubr.msk.bf16.vlgmr.msra.gmra.mxu0 %vm588_vm6, %v1359_v60  ;;  %1202 = vmatmul.mubr.msk.bf16.vlgmr.msra.gmra.mxu1 %vm588_vm6, %v1359_v60  ;;  %v1375_v12 = vld [vmem:[%s1568_s18 + $0xa0] sm:$0xff]   ;;  %v1379_v16 = vld [vmem:[%s1568_s18 + $0x98] sm:$0xff]   ;;  %v1382_v19 = vld [vmem:[%s1568_s18 + $0x10] sm:$0xff]  }
 0x17c   : > { %1245 = vmatpush3.bf16.msra.mxu0 %v1362_v63  ;;  %1267 = vmatpush3.bf16.msra.mxu1 %v1363_v0  ;;  %v1383_v20 = vld [vmem:[%s1568_s18 + $0x90] sm:$0xff]   ;;  %v1384_v21 = vld [vmem:[%s1568_s18 + $0x48] sm:$0xff]   ;;  %v1388_v25 = vld [vmem:[%s1568_s18 + $0x40] sm:$0xff]  }
 0x17d   : > { %1246 = vmatprep.subr.bf16.mxu0 %v1364_v1  ;;  %1268 = vmatprep.subr.bf16.mxu1 %v1365_v2  ;;  %v1385_v22 = vld [vmem:[%s1568_s18 + $0xc8] sm:$0xff]   ;;  %v1389_v26 = vld [vmem:[%s1568_s18 + $0xc0] sm:$0xff]  }
 0x17e   : > { %v1386_v23 = vld [vmem:[%s1568_s18 + $0x8] sm:$0xff]   ;;  %v1390_v27 = vld [vmem:[%s1568_s18] sm:$0xff]  }
 0x17f   : > { %v1387_v24 = vld [vmem:[%s1568_s18 + $0x88] sm:$0xff]   ;;  %v1391_v28 = vld [vmem:[%s1568_s18 + $0x80] sm:$0xff]  }
 0x180   : > { %1247 = vmatpush3.bf16.msra.mxu0 %v1366_v3  ;;  %1269 = vmatpush3.bf16.msra.mxu1 %v1367_v4  ;;  %v521_v35 = vld [vmem:[%s415_s13] sm:$0xf] }
 0x181   : > { %1248 = vmatprep.subr.bf16.mxu0 %v1368_v5  ;;  %1270 = vmatprep.subr.bf16.mxu1 %v1369_v6  ;;  %v530_v38 = vrot.slane %v521_v35, %v529_v31  ;;  %v538_v39 = vrot.slane %v521_v35, %v537_v32  ;;  %v526_v40 = vrot.slane %v521_v35, %v525_v33 }
 0x182   : > { %v534_v41 = vrot.slane %v521_v35, %v533_v34 }
 0x184   : > { %1249 = vmatpush3.bf16.msra.mxu0 %v1370_v7  ;;  %1271 = vmatpush3.bf16.msra.mxu1 %v1371_v8 }
 0x185   : > { %1250 = vmatprep.subr.bf16.mxu0 %v1372_v9  ;;  %1272 = vmatprep.subr.bf16.mxu1 %v1373_v10  ;;  %v686_v10 = vld [vmem:[#allocation4] sm:$0xff] }
 0x188   : > { %1251 = vmatpush3.bf16.msra.mxu0 %v1374_v11  ;;  %1273 = vmatpush3.bf16.msra.mxu1 %v1375_v12 }
 0x189   : > { %1252 = vmatprep.subr.bf16.mxu0 %v1376_v13  ;;  %1274 = vmatprep.subr.bf16.mxu1 %v1377_v14 }
 0x18c   : > { %1253 = vmatpush3.bf16.msra.mxu0 %v1378_v15  ;;  %1275 = vmatpush3.bf16.msra.mxu1 %v1379_v16 }
 0x18d   : > { %1254 = vmatprep.subr.bf16.mxu0 %v1380_v17  ;;  %1276 = vmatprep.subr.bf16.mxu1 %v1381_v18 }
 0x190   : > { %1255 = vmatpush3.bf16.msra.mxu0 %v1382_v19  ;;  %1277 = vmatpush3.bf16.msra.mxu1 %v1383_v20  ;;  %v687_v19 = vld [vmem:[#allocation4 + $0x8] sm:$0xff] }
 0x191   : > { %1256 = vmatprep.subr.bf16.mxu0 %v1384_v21  ;;  %1278 = vmatprep.subr.bf16.mxu1 %v1385_v22 }
 0x194   : > { %1257 = vmatpush3.bf16.msra.mxu0 %v1386_v23  ;;  %1279 = vmatpush3.bf16.msra.mxu1 %v1387_v24 }
 0x195   : > { %1258 = vmatprep.subr.bf16.mxu0 %v1388_v25  ;;  %1280 = vmatprep.subr.bf16.mxu1 %v1389_v26 }
 0x198   : > { %1259 = vmatpush3.bf16.msra.mxu0 %v1390_v27  ;;  %1281 = vmatpush3.bf16.msra.mxu1 %v1391_v28 }
 0x23b   : > { %v626_v36 = vpop.f32.mrf.mxu0  ;;  %v669_v37 = vpop.f32.mrf.mxu1 }
 0x23c   : > { %v627_v50 = vadd.f32 %v626_v36, %v526_v40  ;;  %v670_v51 = vadd.f32 %v669_v37, %v534_v41 }
 0x23d   : > { %v628_v42 = vpop.f32.mrf.mxu0  ;;  %v671_v43 = vpop.f32.mrf.mxu1 }
 0x23e   : > { %v629_v46 = vadd.f32 %v628_v42, %v530_v38  ;;  %v672_v47 = vadd.f32 %v671_v43, %v538_v39  ;;  %v678_v62 = vmax.f32 %v627_v50, 0.0  ;;  %v680_v63 = vmax.f32 %v670_v51, 0.0 }
 0x23f   : > { %v630_v44 = vpop.f32.mrf.mxu0  ;;  %v673_v45 = vpop.f32.mrf.mxu1 }
 0x240   : > { %v631_v48 = vadd.f32 %v630_v44, %v526_v40  ;;  %v674_v49 = vadd.f32 %v673_v45, %v534_v41  ;;  %v679_v58 = vmax.f32 %v629_v46, 0.0  ;;  %v681_v59 = vmax.f32 %v672_v47, 0.0 }
 0x241   : > { %v632_v52 = vpop.f32.mrf.mxu0  ;;  %v675_v53 = vpop.f32.mrf.mxu1 }
 0x242   : > { %v633_v54 = vadd.f32 %v632_v52, %v530_v38  ;;  %v676_v55 = vadd.f32 %v675_v53, %v538_v39  ;;  %v682_v56 = vmax.f32 %v631_v48, 0.0  ;;  %v684_v57 = vmax.f32 %v674_v49, 0.0 }
 0x244   : > { %v683_v60 = vmax.f32 %v633_v54, 0.0  ;;  %v685_v61 = vmax.f32 %v676_v55, 0.0  ;;  %v688_v2 = vpack.c.bf16 %v682_v56, %v678_v62  ;;  %v690_v3 = vpack.c.bf16 %v684_v57, %v680_v63 }
 0x246   : > { %v689_v0 = vpack.c.bf16 %v683_v60, %v679_v58  ;;  %v691_v1 = vpack.c.bf16 %v685_v61, %v681_v59 }
 0x248   : > { %980 = vmatprep.mubr.bf16.mxu0 %v689_v0  ;;  %1021 = vmatprep.mubr.bf16.mxu1 %v691_v1 }
 0x249   : > { %981 = vmatmul.mubr.bf16.vlgmr.msra.gmra.mxu0 %v688_v2  ;;  %1022 = vmatmul.mubr.bf16.vlgmr.msra.gmra.mxu1 %v690_v3 }
 0x309   : > { %v1260_v4 = vpop.f32.mrf.mxu0  ;;  %v1282_v5 = vpop.f32.mrf.mxu1 }
 0x30b   : > { %v1261_v6 = vpop.f32.mrf.mxu0  ;;  %v1283_v7 = vpop.f32.mrf.mxu1 }
 0x30c   : > { %v1262_v8 = vadd.f32 %v1261_v6, %v1260_v4  ;;  %v1284_v9 = vadd.f32 %v1283_v7, %v1282_v5 }
 0x30d   : > { %v1263_v11 = vpop.f32.mrf.mxu0  ;;  %v1285_v12 = vpop.f32.mrf.mxu1 }
 0x30e   : > { %v1024_v13 = vadd.f32 %v1284_v9, %v1262_v8 }
 0x30f   : > { %v1264_v14 = vpop.f32.mrf.mxu0  ;;  %v1286_v15 = vpop.f32.mrf.mxu1 }
 0x310   : > { %v1030_v16 = vadd.f32 %v1024_v13, %v686_v10  ;;  %v1265_v17 = vadd.f32 %v1264_v14, %v1263_v11  ;;  %v1287_v18 = vadd.f32 %v1286_v15, %v1285_v12 }
 0x312   : > { %1032 = vst.msk [vmem:[#allocation4] sm:$0xff] %vm588_vm6, %v1030_v16  ;;  %v1027_v20 = vadd.f32 %v1287_v18, %v1265_v17  ;;  %1037 = sbr.rel (%p1235_p12) target bundleno = 803 (0x323), region = 83 }
 0x314   : > { %v1031_v21 = vadd.f32 %v1027_v20, %v687_v19 }
 0x316   : > { %1033 = vst.msk [vmem:[#allocation4 + $0x8] sm:$0xff] %vm588_vm6, %v1031_v21 }
 0x317   : > { %v1236_v23 = vld [vmem:[%s1690_s6] ss:$0 sm:$0xff]  ;;  %v1050_v27 = vld [vmem:[%s1691_s7 + $0x8] sm:$0xff] }
 0x318   : > { %v1049_v24 = vld [vmem:[%s1691_s7] sm:$0xff] }
 0x319   : > { %v1038_v22 = vld [vmem:[#allocation4] sm:$0xff] }
 0x31a   : > { %v1047_v25 = vadd.f32 %v1236_v23, %v1038_v22 }
 0x31c   : > { %v1051_v29 = vadd.f32 %v1049_v24, %v1047_v25 }
 0x31d   : > { %v1039_v26 = vld [vmem:[#allocation4 + $0x8] sm:$0xff] }
 0x31e   : > { %v1048_v28 = vadd.f32 %v1236_v23, %v1039_v26  ;;  %1053 = vst.msk [vmem:[#allocation4] sm:$0xff] %vm588_vm6, %v1051_v29 }
 0x320   : > { %v1052_v30 = vadd.f32 %v1050_v27, %v1048_v28 }
 0x322   : > { %1054 = vst.msk [vmem:[#allocation4 + $0x8] sm:$0xff] %vm588_vm6, %v1052_v30 }
 0x323 PF: > { %p1654_p13 = scmp.eq.s32.totalorder %s1174_s10, 3  ;;  %s1462_s20 = smov [#allocation4]  }
 0x324   : > { %s1064_s21 = sshll.u32 %s1462_s20, 4  ;;  %s1065_s21 = int_to_ptr.vmem [resolvable:$true] %s1064_s21 }
 0x325   : > { %s1392_s22 = scalar_lea.vmem %s1065_s21, 256  ;;  %p1399_p3 = scmp.lt.s32.totalorder %s1065_s21, %s1065_s21 }
 0x326   : > { %p1393_p0 = scmp.ne.s32.totalorder %s1065_s21, %s1392_s22  ;;  %p1400_p4 = scmp.lt.s32.totalorder %s1392_s22, %s1392_s22 }
 0x328   : > { %p1394_p1 = pnand %p1393_p0, %p1654_p13  ;;  %p1401_p5 = por %p1400_p4, %p1399_p3 }
 0x32a   : > { %p1395_p2 = pneg %p1394_p1 }
 0x32c   : > { %p1402_p6 = pnand %p1401_p5, %p1395_p2 }
 0x32e   : > { %1405 = shalt.err (!%p1402_p6)
}
 0x32f   : > { %s1463_s24 = smov 128   ;;  %s1464_s10 = smov 8  }
 0x330   : > { %1289 = dma.vmem_to_hbm [thread:$0]  (%p1654_p13), %s1065_s21, 256, %s1692_s8, [#allocation5], %s1463_s24, %s1463_s24, %s1464_s10  }
 0x331   : > { %1437 = dma.done.wait (%p1654_p13), [#allocation5], 256  }
 0x332   : > { %1439 = vsyncadd (%p1654_p13), [#allocation5], 4294967040 }
 0x333 PF: > { %s19_s9 = sadd.s32 1, %s1458_s9   ;;  %s1694_s27 = smov %s1446_s28 }
 0x334   : > { %p16_p7 = scmp.ge.s32.totalorder %s19_s9, 6   ;;  %s1695_s28 = smov %s1546_s14 }
 0x335   : > { %s1696_s29 = smov %s1454_s30  ;;  %s1697_s30 = smov %s1699_s11 }
 0x336   :  { %18 = sbr.rel (!%p16_p7) target bundleno = 3 (0x3), region = 128 }
 0x33b   :  { %1080 = vsyncpa [#allocation5], 1 }
 0x33c   :  { %1082 = vsyncpa [#allocation5 + $0x1], 1 }

</bundles_post_ra>
